<compile_context>
chip_gen: v7x
topology: tpu7x:2x2x1
jax: 0.10.0
libtpu: 0.0.40
codegen_flags: <defaults>
</compile_context>

<pallas_src>
import jax
import jax.numpy as jnp
import numpy as np
from jax import lax
from jax.experimental import pallas as pl
from jax.experimental.pallas import tpu as pltpu

# ---- small deterministic configs ----
B = 2          # batch
SEQ = 16       # configs.seq_len
PRED = 8       # configs.pred_len
N_CH = 8       # configs.enc_in
D_EMB = 4      # configs.embed_size
D_MODEL = 32   # configs.d_model
D_FF = 64      # configs.d_ff
EPS = 1e-5     # RevIN / LayerNorm eps
BN = B * N_CH  # flattened row count

_PREC = lax.Precision.HIGHEST   # explicit per-dot precision (kernel is overhead
                                # bound at these sizes; keeps f32-exact sums)


def _ln(v, g, b):
    mu = jnp.mean(v, axis=-1, keepdims=True)
    var = jnp.mean((v - mu) ** 2, axis=-1, keepdims=True)
    return (v - mu) * lax.rsqrt(var + EPS) * g + b


def _gelu(v):  # exact (erf) GELU, matching torch nn.GELU / F.gelu defaults
    return 0.5 * v * (1.0 + lax.erf(v * (2.0 ** -0.5)))


def olinear_kernel(
    x_ref,        # (B*N, T)
    rev_ref,      # (B*N, 2)   [affine_weight | affine_bias] per row
    w1_ref,       # (T, DM)    emb folded into seq*D -> d_model projection
    attn_ref,     # (B*N, B*N) block-diag softmax(NormLin weight)
    wc1_ref,      # (DM, DFF)  FFN conv1 (1x1)
    wc2_ref,      # (DFF, DM)  FFN conv2 (1x1)
    wfold_ref,    # (DM, DFF)  fused (d_model -> pred*D) @ fc.0
    wf2_ref,      # (DFF, P)   fc.2
    v32_ref,      # (8, DM)    rows: b1, g1, be1, bc2, g2, be2, gE, beE
    v64_ref,      # (2, DFF)   rows: bc1, b_fold
    bf2_ref,      # (1, P)
    out_ref,      # (B*N, P)
):
    xb = x_ref[...]                                           # (BN, T)

    v32 = v32_ref[...]
    b1, g1, be1, bc2 = v32[0:1], v32[1:2], v32[2:3], v32[3:4]
    g2, be2, gE, beE = v32[4:5], v32[5:6], v32[6:7], v32[7:8]
    v64 = v64_ref[...]
    bc1, b_fold = v64[0:1], v64[1:2]

    aw = rev_ref[:, 0:1]                                      # (BN, 1)
    ab = rev_ref[:, 1:2]

    # ---- RevIN norm (stats over time, per (b, n) row) ----
    mean = jnp.mean(xb, axis=1, keepdims=True)                # (BN, 1)
    var = jnp.mean((xb - mean) ** 2, axis=1, keepdims=True)
    inv_std = lax.rsqrt(var + EPS)
    xn = (xb - mean) * inv_std * aw + ab                      # (BN, T)

    # ---- tokenEmb * embeddings folded with Linear(seq*D -> d_model) ----
    h = jnp.dot(xn, w1_ref[...], preferred_element_type=jnp.float32,
                precision=_PREC) + b1                         # (BN, DM)

    # ---- LinearEncoder: NormLin token mixing (block-diag) + FFN + LNs ----
    mixed = jnp.dot(attn_ref[...], h, preferred_element_type=jnp.float32,
                    precision=_PREC)
    x1 = _ln(h + mixed, g1, be1)
    y = _gelu(jnp.dot(x1, wc1_ref[...], preferred_element_type=jnp.float32,
                      precision=_PREC) + bc1)
    y = jnp.dot(y, wc2_ref[...], preferred_element_type=jnp.float32,
                precision=_PREC) + bc2
    x2 = _ln(x1 + y, g2, be2)
    x2 = _ln(x2, gE, beE)                                     # Encoder_ori norm

    # ---- fused ortho_trans out-proj + fc.0, GELU, then fc.2 ----
    hf = _gelu(jnp.dot(x2, wfold_ref[...], preferred_element_type=jnp.float32,
                       precision=_PREC) + b_fold)             # (BN, DFF)
    o = jnp.dot(hf, wf2_ref[...], preferred_element_type=jnp.float32,
                precision=_PREC) + bf2_ref[...]               # (BN, P)

    # ---- RevIN denorm ----
    stdev = (var + EPS) * inv_std                             # = sqrt(var+EPS)
    denorm_scale = stdev * pl.reciprocal(aw + EPS * EPS, approx=True)
    out_ref[...] = (o - ab) * denorm_scale + mean


def make_params(key):
    ks = jax.random.split(key, 16)

    def rn(k, shape, scale=0.1):
        return jax.random.normal(k, shape, jnp.float32) * scale

    p = {}
    p['aw'] = jnp.ones((N_CH,), jnp.float32)     # RevIN affine_weight (torch init)
    p['ab'] = jnp.zeros((N_CH,), jnp.float32)    # RevIN affine_bias
    p['emb'] = rn(ks[0], (1, D_EMB), 1.0)        # nn.Parameter(torch.randn(1, D))
    p['W1'] = rn(ks[1], (D_MODEL, SEQ * D_EMB)); p['b1'] = rn(ks[2], (D_MODEL,))
    p['A'] = rn(ks[3], (N_CH, N_CH), 1.0)        # NormLin token-mixing weight
    p['g1'] = jnp.ones((D_MODEL,), jnp.float32); p['be1'] = jnp.zeros((D_MODEL,), jnp.float32)
    p['Wc1'] = rn(ks[4], (D_FF, D_MODEL)); p['bc1'] = rn(ks[5], (D_FF,))
    p['Wc2'] = rn(ks[6], (D_MODEL, D_FF)); p['bc2'] = rn(ks[7], (D_MODEL,))
    p['g2'] = jnp.ones((D_MODEL,), jnp.float32); p['be2'] = jnp.zeros((D_MODEL,), jnp.float32)
    p['gE'] = jnp.ones((D_MODEL,), jnp.float32); p['beE'] = jnp.zeros((D_MODEL,), jnp.float32)
    p['W2'] = rn(ks[8], (PRED * D_EMB, D_MODEL)); p['b2'] = rn(ks[9], (PRED * D_EMB,))
    p['Wf1'] = rn(ks[10], (D_FF, PRED * D_EMB)); p['bf1'] = rn(ks[11], (D_FF,))
    p['Wf2'] = rn(ks[12], (PRED, D_FF)); p['bf2'] = rn(ks[13], (PRED,))
    return p


def _prep_operands(x, p):
    """Fold / pack parameters into the 11 kernel operands (all f32)."""
    with jax.default_matmul_precision("highest"):      # exact weight folds
        xk = jnp.transpose(x, (0, 2, 1)).reshape(BN, SEQ)          # (B*N, T)

        aw = jnp.tile(p['aw'], B).reshape(BN, 1)
        ab = jnp.tile(p['ab'], B).reshape(BN, 1)
        rev = jnp.concatenate([aw, ab], axis=1)                    # (B*N, 2)

        # embeddings folded into W1: feature k of flatten(-2) is d*T + t.
        w1r = p['W1'].reshape(D_MODEL, D_EMB, SEQ)                 # [m, d, t]
        w1_eff = jnp.einsum('d,mdt->tm', p['emb'][0], w1r)         # (T, DM)

        # batch-independent softmax, block-diagonal over the batch
        attn = jax.nn.softmax(p['A'], axis=-1)                     # (N, N)
        attn_bd = jnp.kron(jnp.eye(B, dtype=jnp.float32), attn)    # (B*N, B*N)

        wc1T = p['Wc1'].T
        wc2T = p['Wc2'].T

        # fuse ortho_trans out-proj with fc.0; the (D,P)->(P,D) transpose is a
        # column permutation of Wf1: Wf1p[:, d*P+p] = Wf1[:, p*D+d]
        wf1p = p['Wf1'].reshape(D_FF, PRED, D_EMB).transpose(0, 2, 1)
        wf1T = wf1p.reshape(D_FF, PRED * D_EMB).T                  # (P*D, DFF)
        w_fold = p['W2'].T @ wf1T                                  # (DM, DFF)
        b_fold = p['b2'].reshape(1, PRED * D_EMB) @ wf1T \
            + p['bf1'].reshape(1, D_FF)                            # (1, DFF)

        wf2T = p['Wf2'].T                                          # (DFF, P)
        bf2 = p['bf2'].reshape(1, PRED)

        v32 = jnp.stack([p['b1'], p['g1'], p['be1'], p['bc2'],
                         p['g2'], p['be2'], p['gE'], p['beE']])    # (8, DM)
        v64 = jnp.stack([p['bc1'], b_fold[0]])                     # (2, DFF)

    return (xk, rev, w1_eff, attn_bd, wc1T, wc2T, w_fold, wf2T, v32, v64, bf2)


def olinear_forward(x, p):
    """x: (B, T, N) float32 (PyTorch layout). Returns (B, pred_len, N)."""
    operands = _prep_operands(x, p)
    out2d = pl.pallas_call(
        olinear_kernel,
        out_shape=jax.ShapeDtypeStruct((BN, PRED), jnp.float32),
        in_specs=[pl.BlockSpec(memory_space=pltpu.MemorySpace.VMEM)
                  for _ in operands],
        out_specs=pl.BlockSpec(memory_space=pltpu.MemorySpace.VMEM),
    )(*operands)
    out = out2d.reshape(B, N_CH, PRED)
    return jnp.transpose(out, (0, 2, 1))                           # (B, P, N)


def reference_forward(x, p):
    """Pure-JAX reference following the PyTorch code path verbatim."""
    with jax.default_matmul_precision("highest"):
        mean = jnp.mean(x, axis=1, keepdims=True)
        var = jnp.mean((x - mean) ** 2, axis=1, keepdims=True)
        stdev = jnp.sqrt(var + EPS)
        xn = (x - mean) / stdev * p['aw'] + p['ab']                   # (B,T,N)
        xe = jnp.transpose(xn, (0, 2, 1))[..., None] * p['emb'][0]    # (B,N,T,D)
        flat = jnp.transpose(xe, (0, 1, 3, 2)).reshape(B, N_CH, D_EMB * SEQ)
        h = flat @ p['W1'].T + p['b1']                                # (B,N,DM)
        attn = jax.nn.softmax(p['A'], axis=-1)
        mixed = jnp.einsum('ij,bjm->bim', attn, h)
        x1 = _ln(h + mixed, p['g1'], p['be1'])
        y = _gelu(x1 @ p['Wc1'].T + p['bc1'])
        y = y @ p['Wc2'].T + p['bc2']
        x2 = _ln(x1 + y, p['g2'], p['be2'])
        x2 = _ln(x2, p['gE'], p['beE'])
        z = x2 @ p['W2'].T + p['b2']                                  # (B,N,P*D)
        zr = jnp.transpose(z.reshape(B, N_CH, D_EMB, PRED),
                           (0, 1, 3, 2)).reshape(B, N_CH, PRED * D_EMB)
        hf = _gelu(zr @ p['Wf1'].T + p['bf1'])
        o = hf @ p['Wf2'].T + p['bf2']                                # (B,N,P)
        out = jnp.transpose(o, (0, 2, 1))                             # (B,P,N)
        out = (out - p['ab']) / (p['aw'] + EPS * EPS) * stdev + mean
    return out


if __name__ == "__main__":
    key = jax.random.PRNGKey(0)
    kx, kp = jax.random.split(key)
    x = jax.random.normal(kx, (B, SEQ, N_CH), jnp.float32)
    params = make_params(kp)

    out = olinear_forward(x, params)
    out = jax.block_until_ready(out)
    assert out.shape == (B, PRED, N_CH)

    ref = reference_forward(x, params)
    if not np.allclose(np.asarray(out), np.asarray(ref), atol=1e-3, rtol=1e-3):
        raise AssertionError("Pallas kernel does not match JAX reference")
    print("KERNEL_OK")
</pallas_src>

<mosaic_0001>
module attributes {stable_mosaic.version = 11 : i64} {
  func.func @olinear_kernel(%arg0: memref<16x16xf32, #tpu.memory_space<vmem>>, %arg1: memref<16x2xf32, #tpu.memory_space<vmem>>, %arg2: memref<16x32xf32, #tpu.memory_space<vmem>>, %arg3: memref<16x16xf32, #tpu.memory_space<vmem>>, %arg4: memref<32x64xf32, #tpu.memory_space<vmem>>, %arg5: memref<64x32xf32, #tpu.memory_space<vmem>>, %arg6: memref<32x64xf32, #tpu.memory_space<vmem>>, %arg7: memref<64x8xf32, #tpu.memory_space<vmem>>, %arg8: memref<8x32xf32, #tpu.memory_space<vmem>>, %arg9: memref<2x64xf32, #tpu.memory_space<vmem>>, %arg10: memref<1x8xf32, #tpu.memory_space<vmem>>, %arg11: memref<16x8xf32, #tpu.memory_space<vmem>>) attributes {dimension_semantics = [], scalar_prefetch = 0 : i64, scratch_operands = 0 : i64, tpu.core_type = #tpu.core_type<tc>} {
    %c0 = arith.constant 0 : index
    %c0_0 = arith.constant 0 : index
    %0 = vector.load %arg0[%c0, %c0_0] : memref<16x16xf32, #tpu.memory_space<vmem>>, vector<16x16xf32>
    %c0_1 = arith.constant 0 : index
    %c0_2 = arith.constant 0 : index
    %1 = vector.load %arg8[%c0_1, %c0_2] : memref<8x32xf32, #tpu.memory_space<vmem>>, vector<8x32xf32>
    %2 = vector.extract_strided_slice %1 {offsets = [0, 0], sizes = [1, 32], strides = [1, 1]} : vector<8x32xf32> to vector<1x32xf32>
    %3 = vector.extract_strided_slice %1 {offsets = [1, 0], sizes = [1, 32], strides = [1, 1]} : vector<8x32xf32> to vector<1x32xf32>
    %4 = vector.extract_strided_slice %1 {offsets = [2, 0], sizes = [1, 32], strides = [1, 1]} : vector<8x32xf32> to vector<1x32xf32>
    %5 = vector.extract_strided_slice %1 {offsets = [3, 0], sizes = [1, 32], strides = [1, 1]} : vector<8x32xf32> to vector<1x32xf32>
    %6 = vector.extract_strided_slice %1 {offsets = [4, 0], sizes = [1, 32], strides = [1, 1]} : vector<8x32xf32> to vector<1x32xf32>
    %7 = vector.extract_strided_slice %1 {offsets = [5, 0], sizes = [1, 32], strides = [1, 1]} : vector<8x32xf32> to vector<1x32xf32>
    %8 = vector.extract_strided_slice %1 {offsets = [6, 0], sizes = [1, 32], strides = [1, 1]} : vector<8x32xf32> to vector<1x32xf32>
    %9 = vector.extract_strided_slice %1 {offsets = [7, 0], sizes = [1, 32], strides = [1, 1]} : vector<8x32xf32> to vector<1x32xf32>
    %c0_3 = arith.constant 0 : index
    %c0_4 = arith.constant 0 : index
    %10 = vector.load %arg9[%c0_3, %c0_4] : memref<2x64xf32, #tpu.memory_space<vmem>>, vector<2x64xf32>
    %11 = vector.extract_strided_slice %10 {offsets = [0, 0], sizes = [1, 64], strides = [1, 1]} : vector<2x64xf32> to vector<1x64xf32>
    %12 = vector.extract_strided_slice %10 {offsets = [1, 0], sizes = [1, 64], strides = [1, 1]} : vector<2x64xf32> to vector<1x64xf32>
    %c0_5 = arith.constant 0 : index
    %c0_6 = arith.constant 0 : index
    %13 = vector.load %arg1[%c0_5, %c0_6] : memref<16x2xf32, #tpu.memory_space<vmem>>, vector<16x1xf32>
    %c0_7 = arith.constant 0 : index
    %c1 = arith.constant 1 : index
    %14 = vector.load %arg1[%c0_7, %c1] : memref<16x2xf32, #tpu.memory_space<vmem>>, vector<16x1xf32>
    %cst = arith.constant dense<0.000000e+00> : vector<16xf32>
    %15 = vector.multi_reduction <add>, %0, %cst [1] : vector<16x16xf32> to vector<16xf32>
    %16 = vector.shape_cast %15 : vector<16xf32> to vector<16x1xf32>
    %cst_8 = arith.constant 1.600000e+01 : f32
    %17 = vector.broadcast %cst_8 : f32 to vector<16x1xf32>
    %18 = arith.divf %16, %17 : vector<16x1xf32>
    %19 = vector.broadcast %18 : vector<16x1xf32> to vector<16x16xf32>
    %20 = arith.subf %0, %19 : vector<16x16xf32>
    %21 = arith.mulf %20, %20 : vector<16x16xf32>
    %cst_9 = arith.constant dense<0.000000e+00> : vector<16xf32>
    %22 = vector.multi_reduction <add>, %21, %cst_9 [1] : vector<16x16xf32> to vector<16xf32>
    %23 = vector.shape_cast %22 : vector<16xf32> to vector<16x1xf32>
    %cst_10 = arith.constant 1.600000e+01 : f32
    %24 = vector.broadcast %cst_10 : f32 to vector<16x1xf32>
    %25 = arith.divf %23, %24 : vector<16x1xf32>
    %cst_11 = arith.constant 9.99999974E-6 : f32
    %26 = vector.broadcast %cst_11 : f32 to vector<16x1xf32>
    %27 = arith.addf %25, %26 : vector<16x1xf32>
    %28 = math.rsqrt %27 : vector<16x1xf32>
    %29 = vector.broadcast %18 : vector<16x1xf32> to vector<16x16xf32>
    %30 = arith.subf %0, %29 : vector<16x16xf32>
    %31 = vector.broadcast %28 : vector<16x1xf32> to vector<16x16xf32>
    %32 = arith.mulf %30, %31 : vector<16x16xf32>
    %33 = vector.broadcast %13 : vector<16x1xf32> to vector<16x16xf32>
    %34 = arith.mulf %32, %33 : vector<16x16xf32>
    %35 = vector.broadcast %14 : vector<16x1xf32> to vector<16x16xf32>
    %36 = arith.addf %34, %35 : vector<16x16xf32>
    %c0_12 = arith.constant 0 : index
    %c0_13 = arith.constant 0 : index
    %37 = vector.load %arg2[%c0_12, %c0_13] : memref<16x32xf32, #tpu.memory_space<vmem>>, vector<16x32xf32>
    %cst_14 = arith.constant dense<0.000000e+00> : vector<16x32xf32>
    %38 = tpu.matmul %36, %37, %cst_14 {dimension_numbers = #tpu.dot_dimension_numbers<[1], [0], [0], [1], [0, 0, 1, 1], [], []>, precision = #tpu.contract_precision<fp32>} : vector<16x16xf32>, vector<16x32xf32>, vector<16x32xf32> -> vector<16x32xf32>
    %39 = vector.broadcast %2 : vector<1x32xf32> to vector<16x32xf32>
    %40 = arith.addf %38, %39 : vector<16x32xf32>
    %c0_15 = arith.constant 0 : index
    %c0_16 = arith.constant 0 : index
    %41 = vector.load %arg3[%c0_15, %c0_16] : memref<16x16xf32, #tpu.memory_space<vmem>>, vector<16x16xf32>
    %cst_17 = arith.constant dense<0.000000e+00> : vector<16x32xf32>
    %42 = tpu.matmul %41, %40, %cst_17 {dimension_numbers = #tpu.dot_dimension_numbers<[1], [0], [0], [1], [0, 0, 1, 1], [], []>, precision = #tpu.contract_precision<fp32>} : vector<16x16xf32>, vector<16x32xf32>, vector<16x32xf32> -> vector<16x32xf32>
    %43 = arith.addf %40, %42 : vector<16x32xf32>
    %cst_18 = arith.constant dense<0.000000e+00> : vector<16xf32>
    %44 = vector.multi_reduction <add>, %43, %cst_18 [1] : vector<16x32xf32> to vector<16xf32>
    %45 = vector.shape_cast %44 : vector<16xf32> to vector<16x1xf32>
    %cst_19 = arith.constant 3.200000e+01 : f32
    %46 = vector.broadcast %cst_19 : f32 to vector<16x1xf32>
    %47 = arith.divf %45, %46 : vector<16x1xf32>
    %48 = vector.broadcast %47 : vector<16x1xf32> to vector<16x32xf32>
    %49 = arith.subf %43, %48 : vector<16x32xf32>
    %50 = arith.mulf %49, %49 : vector<16x32xf32>
    %cst_20 = arith.constant dense<0.000000e+00> : vector<16xf32>
    %51 = vector.multi_reduction <add>, %50, %cst_20 [1] : vector<16x32xf32> to vector<16xf32>
    %52 = vector.shape_cast %51 : vector<16xf32> to vector<16x1xf32>
    %cst_21 = arith.constant 3.200000e+01 : f32
    %53 = vector.broadcast %cst_21 : f32 to vector<16x1xf32>
    %54 = arith.divf %52, %53 : vector<16x1xf32>
    %55 = vector.broadcast %47 : vector<16x1xf32> to vector<16x32xf32>
    %56 = arith.subf %43, %55 : vector<16x32xf32>
    %cst_22 = arith.constant 9.99999974E-6 : f32
    %57 = vector.broadcast %cst_22 : f32 to vector<16x1xf32>
    %58 = arith.addf %54, %57 : vector<16x1xf32>
    %59 = math.rsqrt %58 : vector<16x1xf32>
    %60 = vector.broadcast %59 : vector<16x1xf32> to vector<16x32xf32>
    %61 = arith.mulf %56, %60 : vector<16x32xf32>
    %62 = vector.broadcast %3 : vector<1x32xf32> to vector<16x32xf32>
    %63 = arith.mulf %61, %62 : vector<16x32xf32>
    %64 = vector.broadcast %4 : vector<1x32xf32> to vector<16x32xf32>
    %65 = arith.addf %63, %64 : vector<16x32xf32>
    %c0_23 = arith.constant 0 : index
    %c0_24 = arith.constant 0 : index
    %66 = vector.load %arg4[%c0_23, %c0_24] : memref<32x64xf32, #tpu.memory_space<vmem>>, vector<32x64xf32>
    %cst_25 = arith.constant dense<0.000000e+00> : vector<16x64xf32>
    %67 = tpu.matmul %65, %66, %cst_25 {dimension_numbers = #tpu.dot_dimension_numbers<[1], [0], [0], [1], [0, 0, 1, 1], [], []>, precision = #tpu.contract_precision<fp32>} : vector<16x32xf32>, vector<32x64xf32>, vector<16x64xf32> -> vector<16x64xf32>
    %68 = vector.broadcast %11 : vector<1x64xf32> to vector<16x64xf32>
    %69 = arith.addf %67, %68 : vector<16x64xf32>
    %cst_26 = arith.constant 5.000000e-01 : f32
    %70 = vector.broadcast %cst_26 : f32 to vector<16x64xf32>
    %71 = arith.mulf %70, %69 : vector<16x64xf32>
    %cst_27 = arith.constant 0.707106769 : f32
    %72 = vector.broadcast %cst_27 : f32 to vector<16x64xf32>
    %73 = arith.mulf %69, %72 : vector<16x64xf32>
    %74 = math.erf %73 : vector<16x64xf32>
    %cst_28 = arith.constant 1.000000e+00 : f32
    %75 = vector.broadcast %cst_28 : f32 to vector<16x64xf32>
    %76 = arith.addf %75, %74 : vector<16x64xf32>
    %77 = arith.mulf %71, %76 : vector<16x64xf32>
    %c0_29 = arith.constant 0 : index
    %c0_30 = arith.constant 0 : index
    %78 = vector.load %arg5[%c0_29, %c0_30] : memref<64x32xf32, #tpu.memory_space<vmem>>, vector<64x32xf32>
    %cst_31 = arith.constant dense<0.000000e+00> : vector<16x32xf32>
    %79 = tpu.matmul %77, %78, %cst_31 {dimension_numbers = #tpu.dot_dimension_numbers<[1], [0], [0], [1], [0, 0, 1, 1], [], []>, precision = #tpu.contract_precision<fp32>} : vector<16x64xf32>, vector<64x32xf32>, vector<16x32xf32> -> vector<16x32xf32>
    %80 = vector.broadcast %5 : vector<1x32xf32> to vector<16x32xf32>
    %81 = arith.addf %79, %80 : vector<16x32xf32>
    %82 = arith.addf %65, %81 : vector<16x32xf32>
    %cst_32 = arith.constant dense<0.000000e+00> : vector<16xf32>
    %83 = vector.multi_reduction <add>, %82, %cst_32 [1] : vector<16x32xf32> to vector<16xf32>
    %84 = vector.shape_cast %83 : vector<16xf32> to vector<16x1xf32>
    %cst_33 = arith.constant 3.200000e+01 : f32
    %85 = vector.broadcast %cst_33 : f32 to vector<16x1xf32>
    %86 = arith.divf %84, %85 : vector<16x1xf32>
    %87 = vector.broadcast %86 : vector<16x1xf32> to vector<16x32xf32>
    %88 = arith.subf %82, %87 : vector<16x32xf32>
    %89 = arith.mulf %88, %88 : vector<16x32xf32>
    %cst_34 = arith.constant dense<0.000000e+00> : vector<16xf32>
    %90 = vector.multi_reduction <add>, %89, %cst_34 [1] : vector<16x32xf32> to vector<16xf32>
    %91 = vector.shape_cast %90 : vector<16xf32> to vector<16x1xf32>
    %cst_35 = arith.constant 3.200000e+01 : f32
    %92 = vector.broadcast %cst_35 : f32 to vector<16x1xf32>
    %93 = arith.divf %91, %92 : vector<16x1xf32>
    %94 = vector.broadcast %86 : vector<16x1xf32> to vector<16x32xf32>
    %95 = arith.subf %82, %94 : vector<16x32xf32>
    %cst_36 = arith.constant 9.99999974E-6 : f32
    %96 = vector.broadcast %cst_36 : f32 to vector<16x1xf32>
    %97 = arith.addf %93, %96 : vector<16x1xf32>
    %98 = math.rsqrt %97 : vector<16x1xf32>
    %99 = vector.broadcast %98 : vector<16x1xf32> to vector<16x32xf32>
    %100 = arith.mulf %95, %99 : vector<16x32xf32>
    %101 = vector.broadcast %6 : vector<1x32xf32> to vector<16x32xf32>
    %102 = arith.mulf %100, %101 : vector<16x32xf32>
    %103 = vector.broadcast %7 : vector<1x32xf32> to vector<16x32xf32>
    %104 = arith.addf %102, %103 : vector<16x32xf32>
    %cst_37 = arith.constant dense<0.000000e+00> : vector<16xf32>
    %105 = vector.multi_reduction <add>, %104, %cst_37 [1] : vector<16x32xf32> to vector<16xf32>
    %106 = vector.shape_cast %105 : vector<16xf32> to vector<16x1xf32>
    %cst_38 = arith.constant 3.200000e+01 : f32
    %107 = vector.broadcast %cst_38 : f32 to vector<16x1xf32>
    %108 = arith.divf %106, %107 : vector<16x1xf32>
    %109 = vector.broadcast %108 : vector<16x1xf32> to vector<16x32xf32>
    %110 = arith.subf %104, %109 : vector<16x32xf32>
    %111 = arith.mulf %110, %110 : vector<16x32xf32>
    %cst_39 = arith.constant dense<0.000000e+00> : vector<16xf32>
    %112 = vector.multi_reduction <add>, %111, %cst_39 [1] : vector<16x32xf32> to vector<16xf32>
    %113 = vector.shape_cast %112 : vector<16xf32> to vector<16x1xf32>
    %cst_40 = arith.constant 3.200000e+01 : f32
    %114 = vector.broadcast %cst_40 : f32 to vector<16x1xf32>
    %115 = arith.divf %113, %114 : vector<16x1xf32>
    %116 = vector.broadcast %108 : vector<16x1xf32> to vector<16x32xf32>
    %117 = arith.subf %104, %116 : vector<16x32xf32>
    %cst_41 = arith.constant 9.99999974E-6 : f32
    %118 = vector.broadcast %cst_41 : f32 to vector<16x1xf32>
    %119 = arith.addf %115, %118 : vector<16x1xf32>
    %120 = math.rsqrt %119 : vector<16x1xf32>
    %121 = vector.broadcast %120 : vector<16x1xf32> to vector<16x32xf32>
    %122 = arith.mulf %117, %121 : vector<16x32xf32>
    %123 = vector.broadcast %8 : vector<1x32xf32> to vector<16x32xf32>
    %124 = arith.mulf %122, %123 : vector<16x32xf32>
    %125 = vector.broadcast %9 : vector<1x32xf32> to vector<16x32xf32>
    %126 = arith.addf %124, %125 : vector<16x32xf32>
    %c0_42 = arith.constant 0 : index
    %c0_43 = arith.constant 0 : index
    %127 = vector.load %arg6[%c0_42, %c0_43] : memref<32x64xf32, #tpu.memory_space<vmem>>, vector<32x64xf32>
    %cst_44 = arith.constant dense<0.000000e+00> : vector<16x64xf32>
    %128 = tpu.matmul %126, %127, %cst_44 {dimension_numbers = #tpu.dot_dimension_numbers<[1], [0], [0], [1], [0, 0, 1, 1], [], []>, precision = #tpu.contract_precision<fp32>} : vector<16x32xf32>, vector<32x64xf32>, vector<16x64xf32> -> vector<16x64xf32>
    %129 = vector.broadcast %12 : vector<1x64xf32> to vector<16x64xf32>
    %130 = arith.addf %128, %129 : vector<16x64xf32>
    %cst_45 = arith.constant 5.000000e-01 : f32
    %131 = vector.broadcast %cst_45 : f32 to vector<16x64xf32>
    %132 = arith.mulf %131, %130 : vector<16x64xf32>
    %cst_46 = arith.constant 0.707106769 : f32
    %133 = vector.broadcast %cst_46 : f32 to vector<16x64xf32>
    %134 = arith.mulf %130, %133 : vector<16x64xf32>
    %135 = math.erf %134 : vector<16x64xf32>
    %cst_47 = arith.constant 1.000000e+00 : f32
    %136 = vector.broadcast %cst_47 : f32 to vector<16x64xf32>
    %137 = arith.addf %136, %135 : vector<16x64xf32>
    %138 = arith.mulf %132, %137 : vector<16x64xf32>
    %c0_48 = arith.constant 0 : index
    %c0_49 = arith.constant 0 : index
    %139 = vector.load %arg7[%c0_48, %c0_49] : memref<64x8xf32, #tpu.memory_space<vmem>>, vector<64x8xf32>
    %cst_50 = arith.constant dense<0.000000e+00> : vector<16x8xf32>
    %140 = tpu.matmul %138, %139, %cst_50 {dimension_numbers = #tpu.dot_dimension_numbers<[1], [0], [0], [1], [0, 0, 1, 1], [], []>, precision = #tpu.contract_precision<fp32>} : vector<16x64xf32>, vector<64x8xf32>, vector<16x8xf32> -> vector<16x8xf32>
    %c0_51 = arith.constant 0 : index
    %c0_52 = arith.constant 0 : index
    %141 = vector.load %arg10[%c0_51, %c0_52] : memref<1x8xf32, #tpu.memory_space<vmem>>, vector<1x8xf32>
    %142 = vector.broadcast %141 : vector<1x8xf32> to vector<16x8xf32>
    %143 = arith.addf %140, %142 : vector<16x8xf32>
    %cst_53 = arith.constant 9.99999974E-6 : f32
    %144 = vector.broadcast %cst_53 : f32 to vector<16x1xf32>
    %145 = arith.addf %25, %144 : vector<16x1xf32>
    %146 = arith.mulf %145, %28 : vector<16x1xf32>
    %cst_54 = arith.constant 1.000000e-10 : f32
    %147 = vector.broadcast %cst_54 : f32 to vector<16x1xf32>
    %148 = arith.addf %13, %147 : vector<16x1xf32>
    %149 = tpu.reciprocal %148 {approx = true} : vector<16x1xf32> -> vector<16x1xf32>
    %150 = arith.mulf %146, %149 : vector<16x1xf32>
    %151 = vector.broadcast %14 : vector<16x1xf32> to vector<16x8xf32>
    %152 = arith.subf %143, %151 : vector<16x8xf32>
    %153 = vector.broadcast %150 : vector<16x1xf32> to vector<16x8xf32>
    %154 = arith.mulf %152, %153 : vector<16x8xf32>
    %155 = vector.broadcast %18 : vector<16x1xf32> to vector<16x8xf32>
    %156 = arith.addf %154, %155 : vector<16x8xf32>
    %c0_55 = arith.constant 0 : index
    %c0_56 = arith.constant 0 : index
    %157 = vector.load %arg11[%c0_55, %c0_56] : memref<16x8xf32, #tpu.memory_space<vmem>>, vector<16x8xf32>
    tpu.vector_store %arg11[%c0_55, %c0_56], %156 {strides = array<i32>} : memref<16x8xf32, #tpu.memory_space<vmem>>, vector<16x8xf32>,
    return
  }
}

</mosaic_0001>

<bundles_post_ra>
// kernel: tpu_custom_call.1
= control target key start
LH: loop header
LB: loop body
LE: loop exit
PB: predicated region body
PF: predicated region fallthrough
CT: control target
= control target key end

     0   :  { %vm44_vm0 = vcmask 130048   ;;  %v4698_v2 = vmov 0   ;;  %v4699_v7 = vmov 1   ;;  %vm1120_vm1 = vcmask 261120   ;;  %s5124_s0 = inlined_call_operand.vmem [shape: f32[16,16], index: 0, kind: input, shape index: {}]   ;;  %s5125_s1 = inlined_call_operand.vmem [shape: f32[16,2], index: 1, kind: input, shape index: {}]   ;;  %s5126_s2 = inlined_call_operand.vmem [shape: f32[16,32], index: 2, kind: input, shape index: {}]   ;;  %s5127_s3 = inlined_call_operand.vmem [shape: f32[16,16], index: 3, kind: input, shape index: {}]   ;;  %s5128_s8 = inlined_call_operand.vmem [shape: f32[8,32], index: 8, kind: input, shape index: {}]   ;;  %s5129_s4 = inlined_call_operand.vmem [shape: f32[32,64], index: 4, kind: input, shape index: {}]   ;;  %s5130_s5 = inlined_call_operand.vmem [shape: f32[64,32], index: 5, kind: input, shape index: {}]   ;;  %s5131_s9 = inlined_call_operand.vmem [shape: f32[2,64], index: 9, kind: input, shape index: {}]   ;;  %s5132_s6 = inlined_call_operand.vmem [shape: f32[32,64], index: 6, kind: input, shape index: {}]   ;;  %s5133_s7 = inlined_call_operand.vmem [shape: f32[64,8], index: 7, kind: input, shape index: {}]   ;;  %s5134_s10 = inlined_call_operand.vmem [shape: f32[1,8], index: 10, kind: input, shape index: {}]   ;;  %s5135_s11 = inlined_call_operand.vmem [shape: f32[16,8], index: 11, kind: output, shape index: {}]  }
   0x1   :  { %v38_v0 = vld [vmem:[%s5124_s0] sm:$0xff]  ;;  %v39_v1 = vld [vmem:[%s5124_s0 + $0x8] sm:$0xff]  ;;  %4667 = vset.pattern.permute.xlu1 %v4698_v2  ;;  %4666 = vset.pattern.permute.xlu0 %v4698_v2  ;;  %vm1724_vm2 = vcmask 523264   ;;  %vm3566_vm3 = vcmask 64512  }
   0x2   :  { %v4769_v3 = vld [vmem:[%s5125_s1 + $0x8] sm:$0xff]  ;;  %v45_v4 = vsel %vm44_vm0, %v38_v0, 0.0  ;;  %v48_v5 = vsel %vm44_vm0, %v39_v1, 0.0  ;;  %v42_v6 = vld [vmem:[%s5125_s1] sm:$0xff] }
   0x3   :  { %79 = vperm.xlu1 %4667, %v4769_v3   ;;  %46 = vadd.xlane.f32.xlu0 %v45_v4  ;;  %v94_v18 = vld [vmem:[%s5126_s2] sm:$0xff]  ;;  %v95_v19 = vld [vmem:[%s5126_s2 + $0x8] sm:$0xff]  ;;  %v3544_v36 = vadd.f32 1e-10, %v42_v6 }
   0x4   :  { %v107_v20 = vand.u32 4294901760, %v94_v18  ;;  %v110_v21 = vand.u32 4294901760, %v95_v19 }
   0x5   :  { %4670 = vrcp.f32 %v3544_v36 }
   0x6   :  { %v4792_v22 = vpack.c.bf16 %v110_v21, %v107_v20  ;;  %v195_v23 = vsub.f32 %v94_v18, %v107_v20  ;;  %v202_v24 = vsub.f32 %v95_v19, %v110_v21  ;;  %v4826_v21 = vld [vmem:[%s5128_s8] sm:$0xff] }
   0x7   :  { %4668 = vset.pattern.permute.xlu1 %v4699_v7  ;;  %49 = vadd.xlane.f32.xlu0 %v48_v5 }
   0x8   :  { %85 = vperm.xlu1 %4668, %v42_v6   ;;  %4259 = vmatprep.subr.bf16.mxu0 %v4792_v22  ;;  %v196_v25 = vand.u32 4294901760, %v195_v23  ;;  %v203_v26 = vand.u32 4294901760, %v202_v24  ;;  %v4266_v32 = vpack.c.bf16 %v202_v24, %v195_v23 }
   0x9   :  { %4261 = vmatpush3.bf16.msra.mxu0 %v4792_v22 }
   0xa   :  { %v197_v27 = vsub.f32 %v195_v23, %v196_v25  ;;  %v204_v28 = vsub.f32 %v202_v24, %v203_v26  ;;  %v4274_v33 = vpack.c.bf16 %v203_v26, %v196_v25 }
   0xc   :  { %v198_v29 = vand.u32 4294901760, %v197_v27  ;;  %v205_v30 = vand.u32 4294901760, %v204_v28 }
   0xe   :  { %v4262_v31 = vpack.c.bf16 %v205_v30, %v198_v29 }
   0xf   :  { %v4671_v43 = vpop.eup %4670 }
  0x10   :  { %4263 = vmatprep.subr.bf16.mxu0 %v4262_v31 }
  0x1d   :  { %74 = vperm.xlu0 %4666, %v42_v6   ;;  %v608_v6 = vld [vmem:[%s5127_s3] sm:$0xff] }
  0x1e   :  { %v611_v7 = vsel %vm44_vm0, %v608_v6, 0 }
  0x82   :  { %v80_v34 = vpop.permute.xlu1 %79 }
  0x87   :  { %v4796_v35 = vpop.permute.xlu1 %85 }
  0x90   :  { %v47_v8 = vpop.xlane.xlu0 %46 }
  0x91   :  { %v4777_v9 = vmul.f32 0.0625, %v47_v8  ;;  %v683_v8 = vand.u32 4294901760, %v611_v7 }
  0x93   :  { %v54_v10 = vsub.f32 %v38_v0, %v4777_v9 }
  0x94   :  { %v50_v11 = vpop.xlane.xlu0 %49 }
  0x95   :  { %v4780_v12 = vmul.f32 0.0625, %v50_v11  ;;  %v56_v13 = vmul.f32 %v54_v10, %v54_v10 }
  0x97   :  { %v55_v14 = vsub.f32 %v39_v1, %v4780_v12  ;;  %v58_v15 = vsel %vm44_vm0, %v56_v13, 0.0 }
  0x98   :  { %59 = vadd.xlane.f32.xlu1 %v58_v15  ;;  %v96_v15 = vlaneseq }
  0x99   :  { %v57_v16 = vmul.f32 %v55_v14, %v55_v14 }
  0x9b   :  { %v61_v17 = vsel %vm44_vm0, %v57_v16, 0.0  ;;  %v609_v16 = vld [vmem:[%s5127_s3 + $0x8] sm:$0xff] }
  0x9c   :  { %62 = vadd.xlane.f32.xlu1 %v61_v17  ;;  %v75_v45 = vpop.permute.xlu0 %74  ;;  %v4819_v17 = vshrl.u32 %v96_v15, 7  ;;  %v614_v18 = vsel %vm44_vm0, %v609_v16, 0 }
  0x9d   :  { %v693_v19 = vand.u32 4294901760, %v614_v18 }
  0x9e   :  { %v98_v20 = vsub.s32 0, %v4819_v17 }
  0xa0   :  { %v99_v23 = vrot.slane %v4826_v21, %v98_v20 }
  0xad   :  { %89 = vperm.xlu1 %4668, %v4769_v3  }
  0xb1   :  { %4669 = vset.pattern.permute.xlu1 %v4698_v2 }
 0x125   :  { %v60_v37 = vpop.xlane.xlu1 %59 }
 0x126   :  { %v64_v38 = vmul.f32 0.0625, %v60_v37 }
 0x128   :  { %v66_v39 = vadd.f32 1e-05, %v64_v38 }
 0x129   :  { %v63_v40 = vpop.xlane.xlu1 %62 }
 0x12a   :  { %4672 = vrsqrt.f32 %v66_v39  ;;  %v65_v41 = vmul.f32 0.0625, %v63_v40 }
 0x12c   :  { %v67_v42 = vadd.f32 1e-05, %v65_v41 }
 0x12d   :  { %v4804_v56 = vpop.permute.xlu1 %89 }
 0x12e   :  { %4674 = vrsqrt.f32 %v67_v42 }
 0x134   :  { %v4673_v44 = vpop.eup %4672 }
 0x135   :  { %v3542_v46 = vmul.f32 %v4673_v44, %v66_v39  ;;  %v70_v47 = vmul.f32 %v4673_v44, %v54_v10  ;;  %v684_v10 = vsub.f32 %v611_v7, %v683_v8  ;;  %v1163_v7 = vld [vmem:[%s5129_s4 + $0x18] sm:$0xff] }
 0x137   :  { %v82_v48 = vmul.f32 %v75_v45, %v70_v47  ;;  %v4798_v49 = vmul.f32 %v4671_v43, %v3542_v46  ;;  %v685_v11 = vand.u32 4294901760, %v684_v10 }
 0x138   :  { %v4675_v50 = vpop.eup %4674 }
 0x139   :  { %v4800_v51 = vmul.f32 %v4675_v50, %v67_v42  ;;  %v71_v52 = vmul.f32 %v4675_v50, %v55_v14  ;;  %v92_v53 = vadd.f32 %v4796_v35, %v82_v48  ;;  %v686_v13 = vsub.f32 %v684_v10, %v685_v11 }
 0x13b   :  { %v83_v54 = vmul.f32 %v80_v34, %v71_v52  ;;  %v101_v55 = vsel %vm44_vm0, %v92_v53, 0  ;;  %v687_v14 = vand.u32 4294901760, %v686_v13 }
 0x13c   :  { %v173_v57 = vand.u32 4294901760, %v101_v55 }
 0x13d   :  { %v93_v58 = vadd.f32 %v4804_v56, %v83_v54  ;;  %3860 = vmatprep.mubr.f32.mxu1 %v687_v14 }
 0x13e   :  { %v174_v59 = vsub.f32 %v101_v55, %v173_v57 }
 0x13f   :  { %v104_v60 = vsel %vm44_vm0, %v93_v58, 0 }
 0x140   :  { %v183_v61 = vand.u32 4294901760, %v104_v60  ;;  %v175_v62 = vand.u32 4294901760, %v174_v59 }
 0x142   :  { %v184_v63 = vsub.f32 %v104_v60, %v183_v61  ;;  %v176_v0 = vsub.f32 %v174_v59, %v175_v62 }
 0x144   :  { %v177_v1 = vand.u32 4294901760, %v176_v0  ;;  %v185_v2 = vand.u32 4294901760, %v184_v63 }
 0x146   :  { %3818 = vmatprep.mubr.f32.mxu0 %v177_v1  ;;  %v186_v4 = vsub.f32 %v184_v63, %v185_v2  ;;  %v1160_v1 = vld [vmem:[%s5129_s4] sm:$0xff] }
 0x148   :  { %v187_v5 = vand.u32 4294901760, %v186_v4  ;;  %v1162_v4 = vld [vmem:[%s5129_s4 + $0x10] sm:$0xff] }
 0x14a   :  { %3819 = vmatmul.mubr.f32.vlgmr.msra.gmra.mrb[0].mxu0 %v187_v5  ;;  %v1175_v5 = vand.u32 4294901760, %v1160_v1 }
 0x14b   :  { %3825 = vmatprep.mubr.f32.mxu0 %v173_v57  ;;  %4265 = vmatpush3.bf16.msra.mxu0 %v4262_v31 }
 0x14c   :  { %4267 = vmatprep.subr.bf16.mxu0 %v4266_v32  ;;  %v1265_v14 = vsub.f32 %v1160_v1, %v1175_v5 }
 0x14e   :  { %v1266_v16 = vand.u32 4294901760, %v1265_v14 }
 0x152   :  { %3826 = vmatmul.mubr.f32.vlgmr.msra.gmra.mrb[0].mxu0 %v183_v61 }
 0x153   :  { %3832 = vmatprep.mubr.f32.mxu0 %v174_v59  ;;  %4269 = vmatpush3.bf16.msra.mxu0 %v4266_v32 }
 0x154   :  { %4271 = vmatprep.subr.bf16.mxu0 %v4792_v22 }
 0x15a   :  { %3833 = vmatmul.mubr.f32.vlgmr.msra.gmra.mrb[0].mxu0 %v184_v63 }
 0x15b   :  { %3839 = vmatprep.mubr.f32.mxu0 %v175_v62  ;;  %4273 = vmatpush3.bf16.msra.mxu0 %v4792_v22 }
 0x15c   :  { %4275 = vmatprep.subr.bf16.mxu0 %v4274_v33 }
 0x162   :  { %3840 = vmatmul.mubr.f32.vlgmr.msra.gmra.mrb[0].mxu0 %v185_v2  ;;  %v1161_v2 = vld [vmem:[%s5129_s4 + $0x8] sm:$0xff] }
 0x163   :  { %3846 = vmatprep.mubr.f32.mxu0 %v173_v57  ;;  %4277 = vmatpush3.bf16.msra.mxu0 %v4274_v33  ;;  %v1178_v6 = vand.u32 4294901760, %v1161_v2 }
 0x164   :  { %4279 = vmatprep.subr.bf16.mxu0 %v4792_v22 }
 0x165   :  { %v1272_v15 = vsub.f32 %v1161_v2, %v1178_v6 }
 0x16a   :  { %3847 = vmatmul.mubr.f32.vlgmr.msra.gmra.mrb[0].mxu0 %v183_v61 }
 0x16b   :  { %3853 = vmatprep.mubr.f32.mxu0 %v173_v57  ;;  %4281 = vmatpush3.bf16.msra.mxu0 %v4792_v22  ;;  %v694_v22 = vsub.f32 %v614_v18, %v693_v19  ;;  %v1273_v18 = vand.u32 4294901760, %v1272_v15 }
 0x16d   :  { %v695_v25 = vand.u32 4294901760, %v694_v22 }
 0x16f   :  { %v696_v31 = vsub.f32 %v694_v22, %v695_v25 }
 0x171   :  { %v697_v37 = vand.u32 4294901760, %v696_v31 }
 0x172   :  { %3854 = vmatmul.mubr.f32.vlgmr.msra.gmra.mrb[0].mxu0 %v183_v61 }
 0x245   :  { %v3855_v24 = vpop.f32.mrb[0].mxu0 }
 0x246   :  { %v4594_v26 = vadd.f32 %v3855_v24, %v99_v23  ;;  %v598_v27 = vpop.f32.mrb[1].mxu0 }
 0x247   :  { %v4595_v28 = vadd.f32 %v598_v27, %v99_v23 }
 0x248   :  { %v620_v29 = vand.u32 4294901760, %v4594_v26 }
 0x249   :  { %v617_v30 = vand.u32 4294901760, %v4595_v28 }
 0x24a   :  { %v712_v32 = vsub.f32 %v4594_v26, %v620_v29 }
 0x24b   :  { %v4282_v33 = vpack.c.bf16 %v620_v29, %v617_v30  ;;  %v705_v34 = vsub.f32 %v4595_v28, %v617_v30 }
 0x24c   :  { %v713_v36 = vand.u32 4294901760, %v712_v32 }
 0x24d   :  { %4283 = vmatprep.subr.bf16.mxu1 %v4282_v33  ;;  %v706_v38 = vand.u32 4294901760, %v705_v34  ;;  %v4290_v44 = vpack.c.bf16 %v712_v32, %v705_v34 }
 0x24e   :  { %4285 = vmatpush3.bf16.msra.mxu1 %v4282_v33  ;;  %v714_v39 = vsub.f32 %v712_v32, %v713_v36 }
 0x24f   :  { %v707_v40 = vsub.f32 %v705_v34, %v706_v38  ;;  %v4298_v45 = vpack.c.bf16 %v713_v36, %v706_v38  ;;  %v4322_v36 = vpack.c.bf16 %v1272_v15, %v1265_v14  ;;  %v4338_v38 = vpack.c.bf16 %v1273_v18, %v1266_v16 }
 0x250   :  { %v715_v41 = vand.u32 4294901760, %v714_v39 }
 0x251   :  { %3861 = vmatmul.mubr.f32.vlgmr.msra.gmra.mrb[0].mxu1 %v697_v37  ;;  %v708_v42 = vand.u32 4294901760, %v707_v40 }
 0x252   :  { %3867 = vmatprep.mubr.f32.mxu1 %v683_v8 }
 0x253   :  { %v4286_v43 = vpack.c.bf16 %v715_v41, %v708_v42 }
 0x255   :  { %4287 = vmatprep.subr.bf16.mxu1 %v4286_v43 }
 0x256   :  { %4289 = vmatpush3.bf16.msra.mxu1 %v4286_v43 }
 0x257   :  { %4291 = vmatprep.subr.bf16.mxu1 %v4290_v44 }
 0x259   :  { %3868 = vmatmul.mubr.f32.vlgmr.msra.gmra.mrb[0].mxu1 %v693_v19 }
 0x25a   :  { %4293 = vmatpush3.bf16.msra.mxu1 %v4290_v44  ;;  %3874 = vmatprep.mubr.f32.mxu1 %v684_v10  ;;  %v1184_v10 = vand.u32 4294901760, %v1163_v7 }
 0x25b   :  { %4295 = vmatprep.subr.bf16.mxu1 %v4282_v33 }
 0x25c   :  { %v1286_v24 = vsub.f32 %v1163_v7, %v1184_v10 }
 0x261   :  { %3875 = vmatmul.mubr.f32.vlgmr.msra.gmra.mrb[0].mxu1 %v694_v22  ;;  %v1274_v22 = vsub.f32 %v1272_v15, %v1273_v18  ;;  %v1713_v15 = vld [vmem:[%s5130_s5 + $0x8] sm:$0xff] }
 0x262   :  { %4297 = vmatpush3.bf16.msra.mxu1 %v4282_v33  ;;  %3881 = vmatprep.mubr.f32.mxu1 %v685_v11  ;;  %v4847_v11 = vpack.c.bf16 %v1178_v6, %v1175_v5  ;;  %v1735_v18 = vand.u32 4294901760, %v1713_v15 }
 0x263   :  { %4299 = vmatprep.subr.bf16.mxu1 %v4298_v45 }
 0x264   :  { %4307 = vmatprep.subr.bf16.mxu0 %v4847_v11 }
 0x265   :  { %4309 = vmatpush3.bf16.msra.mxu0 %v4847_v11 }
 0x269   :  { %3882 = vmatmul.mubr.f32.vlgmr.msra.gmra.mrb[0].mxu1 %v695_v25 }
 0x26a   :  { %4301 = vmatpush3.bf16.msra.mxu1 %v4298_v45  ;;  %3888 = vmatprep.mubr.f32.mxu1 %v683_v8 }
 0x26b   :  { %4303 = vmatprep.subr.bf16.mxu1 %v4282_v33 }
 0x271   :  { %3889 = vmatmul.mubr.f32.vlgmr.msra.gmra.mrb[0].mxu1 %v693_v19 }
 0x272   :  { %4305 = vmatpush3.bf16.msra.mxu1 %v4282_v33  ;;  %3895 = vmatprep.mubr.f32.mxu1 %v683_v8  ;;  %v1181_v8 = vand.u32 4294901760, %v1162_v4 }
 0x274   :  { %v4849_v13 = vpack.c.bf16 %v1184_v10, %v1181_v8  ;;  %v1279_v23 = vsub.f32 %v1162_v4, %v1181_v8 }
 0x276   :  { %4311 = vmatprep.subr.bf16.mxu0 %v4849_v13  ;;  %v1280_v27 = vand.u32 4294901760, %v1279_v23  ;;  %v4326_v37 = vpack.c.bf16 %v1286_v24, %v1279_v23 }
 0x277   :  { %4313 = vmatpush3.bf16.msra.mxu0 %v4849_v13 }
 0x278   :  { %v1281_v30 = vsub.f32 %v1279_v23, %v1280_v27 }
 0x279   :  { %3896 = vmatmul.mubr.f32.vlgmr.msra.gmra.mrb[0].mxu1 %v693_v19  ;;  %v1267_v19 = vsub.f32 %v1265_v14, %v1266_v16  ;;  %v1712_v14 = vld [vmem:[%s5130_s5] sm:$0xff] }
 0x27a   :  { %v1282_v32 = vand.u32 4294901760, %v1281_v30  ;;  %v1732_v16 = vand.u32 4294901760, %v1712_v14 }
 0x27b   :  { %v1268_v25 = vand.u32 4294901760, %v1267_v19 }
 0x27c   :  { %v4883_v19 = vpack.c.bf16 %v1735_v18, %v1732_v16  ;;  %v1826_v30 = vsub.f32 %v1712_v14, %v1732_v16 }
 0x27e   :  { %4355 = vmatprep.subr.bf16.mxu1 %v4883_v19 }
 0x27f   :  { %4357 = vmatpush3.bf16.msra.mxu1 %v4883_v19 }
 0x34c   :  { %v3897_v46 = vpop.f32.mrb[0].mxu1 }
 0x34d   :  { %v1119_v47 = vadd.f32 %v4594_v26, %v3897_v46  ;;  %v1108_v48 = vpop.f32.mrb[1].mxu1  ;;  %v1275_v26 = vand.u32 4294901760, %v1274_v22  ;;  %v1150_v46 = vsub.s32 1, %v4819_v17 }
 0x34e   :  { %v1118_v50 = vadd.f32 %v4595_v28, %v1108_v48  ;;  %v1287_v28 = vand.u32 4294901760, %v1286_v24 }
 0x34f   :  { %v1124_v52 = vsel %vm1120_vm1, %v1119_v47, 0.0  ;;  %v4314_v29 = vpack.c.bf16 %v1275_v26, %v1268_v25  ;;  %v1151_v48 = vrot.slane %v4826_v21, %v1150_v46  ;;  %v1716_v25 = vld [vmem:[%s5130_s5 + $0x20] sm:$0xff]  ;;  %v1717_v26 = vld [vmem:[%s5130_s5 + $0x28] sm:$0xff] }
 0x350   :  { %1125 = vadd.xlane.f32.xlu0 %v1124_v52  ;;  %v1121_v53 = vsel %vm1120_vm1, %v1118_v50, 0.0  ;;  %v1288_v31 = vsub.f32 %v1286_v24, %v1287_v28  ;;  %v4342_v39 = vpack.c.bf16 %v1287_v28, %v1280_v27  ;;  %v1744_v27 = vand.u32 4294901760, %v1716_v25 }
 0x351   :  { %1122 = vadd.xlane.f32.xlu1 %v1121_v53  ;;  %4315 = vmatprep.subr.bf16.mxu0 %v4314_v29  ;;  %v1747_v28 = vand.u32 4294901760, %v1717_v26 }
 0x352   :  { %v1289_v33 = vand.u32 4294901760, %v1288_v31  ;;  %v1833_v31 = vsub.f32 %v1713_v15, %v1735_v18 }
 0x354   :  { %v4318_v34 = vpack.c.bf16 %v1289_v33, %v1282_v32  ;;  %v1718_v32 = vld [vmem:[%s5130_s5 + $0x30] sm:$0xff]  ;;  %v1719_v33 = vld [vmem:[%s5130_s5 + $0x38] sm:$0xff] }
 0x3dd   :  { %v1126_v54 = vpop.xlane.xlu0 %1125 }
 0x3de   :  { %v1129_v55 = vmul.f32 0.03125, %v1126_v54  ;;  %v1123_v57 = vpop.xlane.xlu1 %1122 }
 0x3df   :  { %v1128_v58 = vmul.f32 0.03125, %v1123_v57 }
 0x3e0   :  { %v1131_v59 = vsub.f32 %v1119_v47, %v1129_v55  ;;  %v1156_v47 = vsub.s32 2, %v4819_v17 }
 0x3e1   :  { %v1130_v60 = vsub.f32 %v1118_v50, %v1128_v58 }
 0x3e2   :  { %v1133_v63 = vmul.f32 %v1131_v59, %v1131_v59  ;;  %v1157_v53 = vrot.slane %v4826_v21, %v1156_v47 }
 0x3e3   :  { %v1132_v61 = vmul.f32 %v1130_v60, %v1130_v60 }
 0x3e4   :  { %v1137_v0 = vsel %vm1120_vm1, %v1133_v63, 0.0 }
 0x3e5   :  { %v1134_v62 = vsel %vm1120_vm1, %v1132_v61, 0.0 }
 0x3e6   :  { %1135 = vadd.xlane.f32.xlu1 %v1134_v62 }
 0x3ea   :  { %1138 = vadd.xlane.f32.xlu1 %v1137_v0 }
 0x473   :  { %v1136_v40 = vpop.xlane.xlu1 %1135 }
 0x474   :  { %v1140_v41 = vmul.f32 0.03125, %v1136_v40 }
 0x476   :  { %v1142_v42 = vadd.f32 1e-05, %v1140_v41 }
 0x477   :  { %v1139_v43 = vpop.xlane.xlu1 %1138 }
 0x478   :  { %4676 = vrsqrt.f32 %v1142_v42  ;;  %v1141_v44 = vmul.f32 0.03125, %v1139_v43 }
 0x47a   :  { %v1143_v45 = vadd.f32 1e-05, %v1141_v44 }
 0x47c   :  { %4678 = vrsqrt.f32 %v1143_v45 }
 0x482   :  { %v4677_v50 = vpop.eup %4676 }
 0x483   :  { %v1146_v52 = vmul.f32 %v4677_v50, %v1130_v60 }
 0x485   :  { %v1152_v54 = vmul.f32 %v1151_v48, %v1146_v52 }
 0x486   :  { %v4679_v55 = vpop.eup %4678 }
 0x487   :  { %v1147_v57 = vmul.f32 %v4679_v55, %v1131_v59  ;;  %v4861_v58 = vadd.f32 %v1157_v53, %v1152_v54  ;;  %v1861_v54 = vsub.f32 %v1717_v26, %v1747_v28 }
 0x489   :  { %v1153_v61 = vmul.f32 %v1151_v48, %v1147_v57  ;;  %v1169_v62 = vsel %vm1120_vm1, %v4861_v58, 0 }
 0x48a   :  { %v1243_v63 = vand.u32 4294901760, %v1169_v62 }
 0x48b   :  { %v4865_v0 = vadd.f32 %v1157_v53, %v1153_v61  ;;  %v1854_v53 = vsub.f32 %v1716_v25, %v1744_v27 }
 0x48c   :  { %v1244_v1 = vsub.f32 %v1169_v62, %v1243_v63  ;;  %v1862_v62 = vand.u32 4294901760, %v1861_v54 }
 0x48d   :  { %v1172_v2 = vsel %vm1120_vm1, %v4865_v0, 0  ;;  %v1855_v61 = vand.u32 4294901760, %v1854_v53 }
 0x48e   :  { %v1245_v4 = vand.u32 4294901760, %v1244_v1  ;;  %v1253_v60 = vand.u32 4294901760, %v1172_v2 }
 0x490   :  { %v1246_v5 = vsub.f32 %v1244_v1, %v1245_v4  ;;  %v1254_v6 = vsub.f32 %v1172_v2, %v1253_v60  ;;  %v1863_v2 = vsub.f32 %v1861_v54, %v1862_v62 }
 0x492   :  { %v1247_v7 = vand.u32 4294901760, %v1246_v5  ;;  %v1255_v8 = vand.u32 4294901760, %v1254_v6 }
 0x494   :  { %3906 = vmatprep.mubr.f32.mxu0 %v1247_v7  ;;  %v1256_v59 = vsub.f32 %v1254_v6, %v1255_v8  ;;  %v1864_v7 = vand.u32 4294901760, %v1863_v2 }
 0x496   :  { %v1257_v10 = vand.u32 4294901760, %v1256_v59 }
 0x498   :  { %3907 = vmatmul.mubr.f32.vlgmr.msra.gmra.mrb[2].mxu0 %v1257_v10 }
 0x499   :  { %4317 = vmatpush3.bf16.msra.mxu0 %v4314_v29  ;;  %3917 = vmatprep.mubr.f32.mxu0 %v1243_v63  ;;  %v4903_v29 = vpack.c.bf16 %v1747_v28, %v1744_v27  ;;  %v4924_v28 = vpack.c.bf16 %v1862_v62, %v1855_v61 }
 0x49a   :  { %4319 = vmatprep.subr.bf16.mxu0 %v4318_v34 }
 0x49d   :  { %4321 = vmatpush3.bf16.msra.mxu0 %v4318_v34  ;;  %v1750_v34 = vand.u32 4294901760, %v1718_v32 }
 0x49e   :  { %4323 = vmatprep.subr.bf16.mxu0 %v4322_v36 }
 0x4a0   :  { %3918 = vmatmul.mubr.f32.vlgmr.msra.gmra.mrb[2].mxu0 %v1253_v60 }
 0x4a1   :  { %4325 = vmatpush3.bf16.msra.mxu0 %v4322_v36  ;;  %3928 = vmatprep.mubr.f32.mxu0 %v1244_v1  ;;  %v1753_v36 = vand.u32 4294901760, %v1719_v33  ;;  %v1856_v1 = vsub.f32 %v1854_v53, %v1855_v61 }
 0x4a2   :  { %4327 = vmatprep.subr.bf16.mxu0 %v4326_v37 }
 0x4a5   :  { %4329 = vmatpush3.bf16.msra.mxu0 %v4326_v37  ;;  %v1827_v37 = vand.u32 4294901760, %v1826_v30 }
 0x4a6   :  { %4331 = vmatprep.subr.bf16.mxu0 %v4847_v11 }
 0x4a7   :  { %v1828_v40 = vsub.f32 %v1826_v30, %v1827_v37 }
 0x4a8   :  { %3929 = vmatmul.mubr.f32.vlgmr.msra.gmra.mrb[2].mxu0 %v1254_v6  ;;  %v1857_v6 = vand.u32 4294901760, %v1856_v1 }
 0x4a9   :  { %4333 = vmatpush3.bf16.msra.mxu0 %v4847_v11  ;;  %3939 = vmatprep.mubr.f32.mxu0 %v1245_v4  ;;  %v1829_v44 = vand.u32 4294901760, %v1828_v40  ;;  %v1868_v4 = vsub.f32 %v1718_v32, %v1750_v34 }
 0x4aa   :  { %4335 = vmatprep.subr.bf16.mxu0 %v4849_v13  ;;  %v4378_v10 = vpack.c.bf16 %v1864_v7, %v1857_v6 }
 0x4ad   :  { %4337 = vmatpush3.bf16.msra.mxu0 %v4849_v13 }
 0x4ae   :  { %4339 = vmatprep.subr.bf16.mxu0 %v4338_v38 }
 0x4b0   :  { %3940 = vmatmul.mubr.f32.vlgmr.msra.gmra.mrb[2].mxu0 %v1255_v8  ;;  %v1869_v8 = vand.u32 4294901760, %v1868_v4 }
 0x4b1   :  { %4341 = vmatpush3.bf16.msra.mxu0 %v4338_v38  ;;  %3950 = vmatprep.mubr.f32.mxu0 %v1243_v63  ;;  %v1834_v38 = vand.u32 4294901760, %v1833_v31 }
 0x4b2   :  { %4343 = vmatprep.subr.bf16.mxu0 %v4342_v39  ;;  %v1870_v14 = vsub.f32 %v1868_v4, %v1869_v8 }
 0x4b3   :  { %v1835_v41 = vsub.f32 %v1833_v31, %v1834_v38  ;;  %v4920_v26 = vpack.c.bf16 %v1834_v38, %v1827_v37 }
 0x4b4   :  { %v1871_v16 = vand.u32 4294901760, %v1870_v14 }
 0x4b5   :  { %4345 = vmatpush3.bf16.msra.mxu0 %v4342_v39  ;;  %v4913_v39 = vpack.c.bf16 %v1753_v36, %v1750_v34  ;;  %v1836_v45 = vand.u32 4294901760, %v1835_v41 }
 0x4b6   :  { %4347 = vmatprep.subr.bf16.mxu0 %v4847_v11 }
 0x4b7   :  { %v4917_v50 = vpack.c.bf16 %v1836_v45, %v1829_v44 }
 0x4b8   :  { %3951 = vmatmul.mubr.f32.vlgmr.msra.gmra.mrb[2].mxu0 %v1253_v60 }
 0x4b9   :  { %4349 = vmatpush3.bf16.msra.mxu0 %v4847_v11  ;;  %3961 = vmatprep.mubr.f32.mxu0 %v1243_v63  ;;  %v1714_v11 = vld [vmem:[%s5130_s5 + $0x10] sm:$0xff] }
 0x4ba   :  { %4351 = vmatprep.subr.bf16.mxu0 %v4849_v13  ;;  %v1738_v22 = vand.u32 4294901760, %v1714_v11 }
 0x4bc   :  { %v1840_v42 = vsub.f32 %v1714_v11, %v1738_v22 }
 0x4bd   :  { %4353 = vmatpush3.bf16.msra.mxu0 %v4849_v13  ;;  %v1715_v13 = vld [vmem:[%s5130_s5 + $0x18] sm:$0xff] }
 0x4be   :  { %v1741_v23 = vand.u32 4294901760, %v1715_v13  ;;  %v1841_v47 = vand.u32 4294901760, %v1840_v42 }
 0x4c0   :  { %3962 = vmatmul.mubr.f32.vlgmr.msra.gmra.mrb[2].mxu0 %v1253_v60  ;;  %v4893_v24 = vpack.c.bf16 %v1741_v23, %v1738_v22  ;;  %v1847_v43 = vsub.f32 %v1715_v13, %v1741_v23  ;;  %v1842_v52 = vsub.f32 %v1840_v42, %v1841_v47  ;;  %v1875_v60 = vsub.f32 %v1719_v33, %v1753_v36  ;;  %v4931_v33 = vld [vmem:[%s5131_s9] sm:$0x3] }
 0x4c1   :  { %v4386_v13 = vpack.c.bf16 %v1833_v31, %v1826_v30  ;;  %v4394_v23 = vpack.c.bf16 %v1861_v54, %v1854_v53  ;;  %v1167_v30 = vrot.slane %v4931_v33, %v98_v20 }
 0x4c2   :  { %4359 = vmatprep.subr.bf16.mxu1 %v4893_v24  ;;  %v1848_v48 = vand.u32 4294901760, %v1847_v43  ;;  %v1843_v57 = vand.u32 4294901760, %v1842_v52  ;;  %v1876_v59 = vand.u32 4294901760, %v1875_v60  ;;  %v4390_v22 = vpack.c.bf16 %v1847_v43, %v1840_v42 }
 0x4c3   :  { %4361 = vmatpush3.bf16.msra.mxu1 %v4893_v24  ;;  %v4398_v25 = vpack.c.bf16 %v1875_v60, %v1868_v4 }
 0x4c4   :  { %4363 = vmatprep.subr.bf16.mxu1 %v4903_v29  ;;  %v1849_v55 = vsub.f32 %v1847_v43, %v1848_v48  ;;  %v1877_v15 = vsub.f32 %v1875_v60, %v1876_v59  ;;  %v4922_v27 = vpack.c.bf16 %v1848_v48, %v1841_v47  ;;  %v4926_v32 = vpack.c.bf16 %v1876_v59, %v1869_v8 }
 0x4c6   :  { %v1850_v63 = vand.u32 4294901760, %v1849_v55  ;;  %v1878_v18 = vand.u32 4294901760, %v1877_v15 }
 0x4c7   :  { %4365 = vmatpush3.bf16.msra.mxu1 %v4903_v29 }
 0x4c8   :  { %4367 = vmatprep.subr.bf16.mxu1 %v4913_v39  ;;  %v4374_v5 = vpack.c.bf16 %v1850_v63, %v1843_v57  ;;  %v4382_v11 = vpack.c.bf16 %v1878_v18, %v1871_v16 }
 0x4cb   :  { %4369 = vmatpush3.bf16.msra.mxu1 %v4913_v39 }
 0x4cc   :  { %4371 = vmatprep.subr.bf16.mxu1 %v4917_v50 }
 0x593   :  { %v3963_v31 = vpop.f32.mrb[2].mxu0 }
 0x594   :  { %v4596_v34 = vadd.f32 %v3963_v31, %v1167_v30  ;;  %v1692_v36 = vpop.f32.mrb[3].mxu0  ;;  %v2347_v31 = vsub.s32 5, %v4819_v17 }
 0x595   :  { %v4597_v37 = vadd.f32 %v1692_v36, %v1167_v30  ;;  %v2341_v30 = vsub.s32 4, %v4819_v17 }
 0x596   :  { %v1705_v38 = vmul.f32 0.70710677, %v4596_v34  ;;  %v1703_v43 = vmul.f32 0.5, %v4596_v34 }
 0x597   :  { %v1704_v40 = vmul.f32 0.70710677, %v4597_v37  ;;  %v1702_v45 = vmul.f32 0.5, %v4597_v37  ;;  %v2342_v34 = vrot.slane %v4826_v21, %v2341_v30 }
 0x598   :  { %4680 = verf.f32 %v1705_v38  ;;  %v2348_v38 = vrot.slane %v4826_v21, %v2347_v31 }
 0x599   :  { %4682 = verf.f32 %v1704_v40 }
 0x5a2   :  { %v4681_v41 = vpop.eup %4680 }
 0x5a3   :  { %v4683_v42 = vpop.eup %4682  ;;  %v1709_v44 = vadd.f32 1.0, %v4681_v41 }
 0x5a4   :  { %v1708_v47 = vadd.f32 1.0, %v4683_v42 }
 0x5a5   :  { %v1711_v48 = vmul.f32 %v1709_v44, %v1703_v43 }
 0x5a6   :  { %v1710_v52 = vmul.f32 %v1708_v47, %v1702_v45 }
 0x5a7   :  { %v1729_v53 = vsel %vm1724_vm2, %v1711_v48, 0 }
 0x5a8   :  { %v1814_v20 = vand.u32 4294901760, %v1729_v53  ;;  %v1726_v54 = vsel %vm1724_vm2, %v1710_v52, 0 }
 0x5a9   :  { %v1804_v55 = vand.u32 4294901760, %v1726_v54 }
 0x5aa   :  { %v1815_v57 = vsub.f32 %v1729_v53, %v1814_v20 }
 0x5ab   :  { %v1805_v61 = vsub.f32 %v1726_v54, %v1804_v55 }
 0x5ac   :  { %v1816_v62 = vand.u32 4294901760, %v1815_v57 }
 0x5ad   :  { %v1806_v63 = vand.u32 4294901760, %v1805_v61 }
 0x5ae   :  { %v1817_v1 = vsub.f32 %v1815_v57, %v1816_v62 }
 0x5af   :  { %v1807_v2 = vsub.f32 %v1805_v61, %v1806_v63 }
 0x5b0   :  { %v1818_v60 = vand.u32 4294901760, %v1817_v1  ;;  %v3545_v1 = vadd.f32 1e-10, %v4769_v3  ;;  %v2391_v3 = vld [vmem:[%s5132_s6 + $0x10] sm:$0xff] }
 0x5b1   :  { %v1808_v4 = vand.u32 4294901760, %v1807_v2 }
 0x5b3   :  { %3980 = vmatprep.mubr.f32.mxu1 %v1808_v4 }
 0x5b4   :  { %3981 = vmatmul.mubr.f32.vlgmr.msra.gmra.mrb[2].mxu1 %v1818_v60 }
 0x5b5   :  { %4373 = vmatpush3.bf16.msra.mxu1 %v4917_v50  ;;  %3999 = vmatprep.mubr.f32.mxu1 %v1804_v55  ;;  %v1722_v50 = vsub.s32 3, %v4819_v17 }
 0x5b6   :  { %4375 = vmatprep.subr.bf16.mxu1 %v4374_v5 }
 0x5b9   :  { %4377 = vmatpush3.bf16.msra.mxu1 %v4374_v5  ;;  %v1723_v5 = vrot.slane %v4826_v21, %v1722_v50  ;;  %v2389_v50 = vld [vmem:[%s5132_s6] sm:$0xff] }
 0x5ba   :  { %4379 = vmatprep.subr.bf16.mxu1 %v4378_v10 }
 0x5bd   :  { %4381 = vmatpush3.bf16.msra.mxu1 %v4378_v10 }
 0x5be   :  { %4383 = vmatprep.subr.bf16.mxu1 %v4382_v11 }
 0x5c1   :  { %4385 = vmatpush3.bf16.msra.mxu1 %v4382_v11 }
 0x5c2   :  { %4387 = vmatprep.subr.bf16.mxu1 %v4386_v13 }
 0x5c4   :  { %4000 = vmatmul.mubr.f32.vlgmr.msra.gmra.mrb[2].mxu1 %v1814_v20 }
 0x5c5   :  { %4389 = vmatpush3.bf16.msra.mxu1 %v4386_v13  ;;  %4018 = vmatprep.mubr.f32.mxu1 %v1805_v61 }
 0x5c6   :  { %4391 = vmatprep.subr.bf16.mxu1 %v4390_v22 }
 0x5c9   :  { %4393 = vmatpush3.bf16.msra.mxu1 %v4390_v22 }
 0x5ca   :  { %4395 = vmatprep.subr.bf16.mxu1 %v4394_v23 }
 0x5cd   :  { %4397 = vmatpush3.bf16.msra.mxu1 %v4394_v23 }
 0x5ce   :  { %4399 = vmatprep.subr.bf16.mxu1 %v4398_v25 }
 0x5d1   :  { %4401 = vmatpush3.bf16.msra.mxu1 %v4398_v25 }
 0x5d2   :  { %4403 = vmatprep.subr.bf16.mxu1 %v4883_v19 }
 0x5d4   :  { %4019 = vmatmul.mubr.f32.vlgmr.msra.gmra.mrb[2].mxu1 %v1815_v57 }
 0x5d5   :  { %4405 = vmatpush3.bf16.msra.mxu1 %v4883_v19  ;;  %4037 = vmatprep.mubr.f32.mxu1 %v1806_v63 }
 0x5d6   :  { %4407 = vmatprep.subr.bf16.mxu1 %v4893_v24 }
 0x5d9   :  { %4409 = vmatpush3.bf16.msra.mxu1 %v4893_v24 }
 0x5da   :  { %4411 = vmatprep.subr.bf16.mxu1 %v4903_v29 }
 0x5dd   :  { %4413 = vmatpush3.bf16.msra.mxu1 %v4903_v29 }
 0x5de   :  { %4415 = vmatprep.subr.bf16.mxu1 %v4913_v39 }
 0x5e1   :  { %4417 = vmatpush3.bf16.msra.mxu1 %v4913_v39 }
 0x5e2   :  { %4419 = vmatprep.subr.bf16.mxu1 %v4920_v26 }
 0x5e4   :  { %4038 = vmatmul.mubr.f32.vlgmr.msra.gmra.mrb[2].mxu1 %v1816_v62 }
 0x5e5   :  { %4421 = vmatpush3.bf16.msra.mxu1 %v4920_v26  ;;  %4056 = vmatprep.mubr.f32.mxu1 %v1804_v55 }
 0x5e6   :  { %4423 = vmatprep.subr.bf16.mxu1 %v4922_v27 }
 0x5e9   :  { %4425 = vmatpush3.bf16.msra.mxu1 %v4922_v27 }
 0x5ea   :  { %4427 = vmatprep.subr.bf16.mxu1 %v4924_v28 }
 0x5ed   :  { %4429 = vmatpush3.bf16.msra.mxu1 %v4924_v28 }
 0x5ee   :  { %4431 = vmatprep.subr.bf16.mxu1 %v4926_v32 }
 0x5f1   :  { %4433 = vmatpush3.bf16.msra.mxu1 %v4926_v32 }
 0x5f2   :  { %4435 = vmatprep.subr.bf16.mxu1 %v4883_v19 }
 0x5f4   :  { %4057 = vmatmul.mubr.f32.vlgmr.msra.gmra.mrb[2].mxu1 %v1814_v20 }
 0x5f5   :  { %4437 = vmatpush3.bf16.msra.mxu1 %v4883_v19  ;;  %4075 = vmatprep.mubr.f32.mxu1 %v1804_v55 }
 0x5f6   :  { %4439 = vmatprep.subr.bf16.mxu1 %v4893_v24 }
 0x5f9   :  { %4441 = vmatpush3.bf16.msra.mxu1 %v4893_v24 }
 0x5fa   :  { %4443 = vmatprep.subr.bf16.mxu1 %v4903_v29 }
 0x5fd   :  { %4445 = vmatpush3.bf16.msra.mxu1 %v4903_v29 }
 0x5fe   :  { %4447 = vmatprep.subr.bf16.mxu1 %v4913_v39 }
 0x601   :  { %4449 = vmatpush3.bf16.msra.mxu1 %v4913_v39 }
 0x604   :  { %4076 = vmatmul.mubr.f32.vlgmr.msra.gmra.mrb[2].mxu1 %v1814_v20 }
 0x6d7   :  { %v4077_v6 = vpop.f32.mrb[2].mxu1 }
 0x6d8   :  { %v2301_v19 = vpop.f32.mrb[3].mxu1  ;;  %v4598_v7 = vadd.f32 %v4077_v6, %v1723_v5  ;;  %v2404_v6 = vand.u32 4294901760, %v2389_v50 }
 0x6d9   :  { %v4599_v8 = vadd.f32 %v2301_v19, %v1723_v5  ;;  %v2390_v5 = vld [vmem:[%s5132_s6 + $0x8] sm:$0xff] }
 0x6da   :  { %v2312_v10 = vadd.f32 %v4598_v7, %v4865_v0  ;;  %v2407_v19 = vand.u32 4294901760, %v2390_v5  ;;  %v2410_v7 = vand.u32 4294901760, %v2391_v3 }
 0x6db   :  { %v2311_v59 = vadd.f32 %v4599_v8, %v4861_v58 }
 0x6dc   :  { %v2316_v29 = vsel %vm1120_vm1, %v2312_v10, 0.0  ;;  %v5002_v8 = vpack.c.bf16 %v2407_v19, %v2404_v6 }
 0x6dd   :  { %v2313_v24 = vsel %vm1120_vm1, %v2311_v59, 0.0 }
 0x6de   :  { %2314 = vadd.xlane.f32.xlu1 %v2313_v24  ;;  %v2494_v24 = vsub.f32 %v2389_v50, %v2404_v6  ;;  %4451 = vmatprep.subr.bf16.mxu0 %v5002_v8 }
 0x6df   :  { %4453 = vmatpush3.bf16.msra.mxu0 %v5002_v8 }
 0x6e2   :  { %2317 = vadd.xlane.f32.xlu1 %v2316_v29  ;;  %v2495_v29 = vand.u32 4294901760, %v2494_v24 }
 0x76b   :  { %v2315_v39 = vpop.xlane.xlu1 %2314 }
 0x76c   :  { %v2319_v14 = vmul.f32 0.03125, %v2315_v39 }
 0x76e   :  { %v2321_v15 = vsub.f32 %v2311_v59, %v2319_v14  ;;  %v2496_v14 = vsub.f32 %v2494_v24, %v2495_v29 }
 0x76f   :  { %v2318_v16 = vpop.xlane.xlu1 %2317 }
 0x770   :  { %v2320_v18 = vmul.f32 0.03125, %v2318_v16  ;;  %v2323_v11 = vmul.f32 %v2321_v15, %v2321_v15  ;;  %v2508_v16 = vsub.f32 %v2391_v3, %v2410_v7 }
 0x772   :  { %v2322_v13 = vsub.f32 %v2312_v10, %v2320_v18  ;;  %v2325_v22 = vsel %vm1120_vm1, %v2323_v11, 0.0  ;;  %v2501_v10 = vsub.f32 %v2390_v5, %v2407_v19  ;;  %v2497_v11 = vand.u32 4294901760, %v2496_v14 }
 0x773   :  { %2326 = vadd.xlane.f32.xlu0 %v2325_v22  ;;  %v2509_v22 = vand.u32 4294901760, %v2508_v16 }
 0x774   :  { %v2324_v23 = vmul.f32 %v2322_v13, %v2322_v13  ;;  %v2502_v39 = vand.u32 4294901760, %v2501_v10 }
 0x776   :  { %v2328_v58 = vsel %vm1120_vm1, %v2324_v23, 0.0  ;;  %v4482_v31 = vpack.c.bf16 %v2502_v39, %v2495_v29 }
 0x777   :  { %2329 = vadd.xlane.f32.xlu1 %v2328_v58 }
 0x800   :  { %v2327_v25 = vpop.xlane.xlu0 %2326 }
 0x801   :  { %v2331_v0 = vmul.f32 0.03125, %v2327_v25  ;;  %v2510_v25 = vsub.f32 %v2508_v16, %v2509_v22 }
 0x803   :  { %v2333_v26 = vadd.f32 1e-05, %v2331_v0 }
 0x804   :  { %v2330_v27 = vpop.xlane.xlu1 %2329 }
 0x805   :  { %4684 = vrsqrt.f32 %v2333_v26  ;;  %v2332_v28 = vmul.f32 0.03125, %v2330_v27  ;;  %v2511_v26 = vand.u32 4294901760, %v2510_v25 }
 0x807   :  { %v2334_v32 = vadd.f32 1e-05, %v2332_v28 }
 0x809   :  { %4686 = vrsqrt.f32 %v2334_v32  ;;  %v4466_v32 = vpack.c.bf16 %v2501_v10, %v2494_v24 }
 0x80a   :  { %4688 = vrcp.f32 %v3545_v1 }
 0x80f   :  { %v4685_v36 = vpop.eup %4684 }
 0x810   :  { %v2337_v37 = vmul.f32 %v4685_v36, %v2321_v15  ;;  %v2503_v15 = vsub.f32 %v2501_v10, %v2502_v39 }
 0x812   :  { %v2343_v40 = vmul.f32 %v2342_v34, %v2337_v37 }
 0x813   :  { %v4687_v41 = vpop.eup %4686 }
 0x814   :  { %v2349_v42 = vadd.f32 %v2348_v38, %v2343_v40  ;;  %v2338_v43 = vmul.f32 %v4687_v41, %v2322_v13  ;;  %v4689_v4 = vpop.eup %4688  ;;  %v2504_v13 = vand.u32 4294901760, %v2503_v15  ;;  %v2945_v15 = vld [vmem:[%s5133_s7 + $0x20] sm:$0xff] }
 0x815   :  { %v3549_v60 = vmul.f32 %v4689_v4, %v4800_v51  ;;  %v2392_v51 = vld [vmem:[%s5132_s6 + $0x18] sm:$0xff] }
 0x816   :  { %v2351_v44 = vsel %vm1120_vm1, %v2349_v42, 0.0  ;;  %v2344_v45 = vmul.f32 %v2342_v34, %v2338_v43  ;;  %v4458_v58 = vpack.c.bf16 %v2504_v13, %v2497_v11  ;;  %v2379_v43 = vsub.s32 6, %v4819_v17 }
 0x817   :  { %2352 = vadd.xlane.f32.xlu0 %v2351_v44  ;;  %v2385_v44 = vsub.s32 7, %v4819_v17 }
 0x818   :  { %v2350_v47 = vadd.f32 %v2348_v38, %v2344_v45  ;;  %v2380_v45 = vrot.slane %v4826_v21, %v2379_v43 }
 0x81a   :  { %v2354_v48 = vsel %vm1120_vm1, %v2350_v47, 0.0 }
 0x81b   :  { %2355 = vadd.xlane.f32.xlu1 %v2354_v48 }
 0x8a4   :  { %v2353_v52 = vpop.xlane.xlu0 %2352 }
 0x8a5   :  { %v2357_v53 = vmul.f32 0.03125, %v2353_v52  ;;  %v2386_v52 = vrot.slane %v4826_v21, %v2385_v44 }
 0x8a7   :  { %v4977_v20 = vsub.f32 %v2349_v42, %v2357_v53 }
 0x8a8   :  { %v2356_v54 = vpop.xlane.xlu1 %2355 }
 0x8a9   :  { %v2358_v55 = vmul.f32 0.03125, %v2356_v54  ;;  %v2361_v57 = vmul.f32 %v4977_v20, %v4977_v20 }
 0x8ab   :  { %v4981_v61 = vsub.f32 %v2350_v47, %v2358_v55  ;;  %v2363_v62 = vsel %vm1120_vm1, %v2361_v57, 0.0 }
 0x8ac   :  { %2364 = vadd.xlane.f32.xlu0 %v2363_v62 }
 0x8ad   :  { %v2362_v63 = vmul.f32 %v4981_v61, %v4981_v61 }
 0x8af   :  { %v2366_v2 = vsel %vm1120_vm1, %v2362_v63, 0.0 }
 0x8b0   :  { %2367 = vadd.xlane.f32.xlu1 %v2366_v2 }
 0x8c1   :  { %3559 = vperm.xlu1 %4669, %v3549_v60  }
 0x8c2   :  { %3554 = vperm.xlu0 %4666, %v4798_v49   ;;  %v2413_v49 = vand.u32 4294901760, %v2392_v51 }
 0x8c4   :  { %v5004_v59 = vpack.c.bf16 %v2413_v49, %v2410_v7  ;;  %v2515_v18 = vsub.f32 %v2392_v51, %v2413_v49  ;;  %v2942_v7 = vld [vmem:[%s5133_s7 + $0x8] sm:$0xff] }
 0x8c5   :  { %v2966_v24 = vand.u32 4294901760, %v2942_v7 }
 0x8c6   :  { %4455 = vmatprep.subr.bf16.mxu0 %v5004_v59  ;;  %v2516_v23 = vand.u32 4294901760, %v2515_v18  ;;  %v4470_v30 = vpack.c.bf16 %v2515_v18, %v2508_v16  ;;  %v2946_v16 = vld [vmem:[%s5133_s7 + $0x28] sm:$0xff] }
 0x8c7   :  { %4457 = vmatpush3.bf16.msra.mxu0 %v5004_v59  ;;  %v2978_v11 = vand.u32 4294901760, %v2946_v16 }
 0x8c8   :  { %v2517_v0 = vsub.f32 %v2515_v18, %v2516_v23  ;;  %4459 = vmatprep.subr.bf16.mxu0 %v4458_v58  ;;  %v4486_v34 = vpack.c.bf16 %v2516_v23, %v2509_v22  ;;  %v2975_v18 = vand.u32 4294901760, %v2945_v15  ;;  %v2947_v22 = vld [vmem:[%s5133_s7 + $0x30] sm:$0xff]  ;;  %v2948_v23 = vld [vmem:[%s5133_s7 + $0x38] sm:$0xff] }
 0x8c9   :  { %v2984_v25 = vand.u32 4294901760, %v2948_v23 }
 0x8ca   :  { %v2518_v27 = vand.u32 4294901760, %v2517_v0  ;;  %v5056_v13 = vpack.c.bf16 %v2978_v11, %v2975_v18 }
 0x8cc   :  { %v4462_v28 = vpack.c.bf16 %v2518_v27, %v2511_v26  ;;  %v3064_v27 = vsub.f32 %v2942_v7, %v2966_v24 }
 0x939   :  { %v2365_v36 = vpop.xlane.xlu0 %2364 }
 0x93a   :  { %v2369_v37 = vmul.f32 0.03125, %v2365_v36 }
 0x93c   :  { %v2371_v38 = vadd.f32 1e-05, %v2369_v37 }
 0x93d   :  { %v2368_v40 = vpop.xlane.xlu1 %2367 }
 0x93e   :  { %4690 = vrsqrt.f32 %v2371_v38  ;;  %v2370_v41 = vmul.f32 0.03125, %v2368_v40 }
 0x940   :  { %v2372_v42 = vadd.f32 1e-05, %v2370_v41 }
 0x942   :  { %4692 = vrsqrt.f32 %v2372_v42 }
 0x948   :  { %v4691_v47 = vpop.eup %4690 }
 0x949   :  { %v2375_v48 = vmul.f32 %v4691_v47, %v4977_v20 }
 0x94b   :  { %v2381_v53 = vmul.f32 %v2380_v45, %v2375_v48  ;;  %v3085_v48 = vsub.f32 %v2945_v15, %v2975_v18 }
 0x94c   :  { %v4693_v54 = vpop.eup %4692 }
 0x94d   :  { %v2376_v55 = vmul.f32 %v4693_v54, %v4981_v61  ;;  %v2387_v57 = vadd.f32 %v2386_v52, %v2381_v53  ;;  %v2941_v61 = vld [vmem:[%s5133_s7] sm:$0xff] }
 0x94e   :  { %v2963_v49 = vand.u32 4294901760, %v2941_v61 }
 0x94f   :  { %v2382_v62 = vmul.f32 %v2380_v45, %v2376_v55  ;;  %v2398_v63 = vsel %vm1120_vm1, %v2387_v57, 0  ;;  %v3086_v55 = vand.u32 4294901760, %v3085_v48 }
 0x950   :  { %v2472_v1 = vand.u32 4294901760, %v2398_v63  ;;  %v5032_v10 = vpack.c.bf16 %v2966_v24, %v2963_v49  ;;  %v3057_v26 = vsub.f32 %v2941_v61, %v2963_v49 }
 0x951   :  { %v2388_v2 = vadd.f32 %v2386_v52, %v2382_v62  ;;  %v3092_v52 = vsub.f32 %v2946_v16, %v2978_v11 }
 0x952   :  { %v2473_v4 = vsub.f32 %v2398_v63, %v2472_v1  ;;  %4499 = vmatprep.subr.bf16.mxu1 %v5032_v10  ;;  %v4530_v24 = vpack.c.bf16 %v3064_v27, %v3057_v26 }
 0x953   :  { %v2401_v60 = vsel %vm1120_vm1, %v2388_v2, 0  ;;  %4501 = vmatpush3.bf16.msra.mxu1 %v5032_v10  ;;  %v3093_v57 = vand.u32 4294901760, %v3092_v52 }
 0x954   :  { %v2474_v50 = vand.u32 4294901760, %v2473_v4  ;;  %v2482_v5 = vand.u32 4294901760, %v2401_v60 }
 0x955   :  { %v4570_v2 = vpack.c.bf16 %v3093_v57, %v3086_v55 }
 0x956   :  { %v2475_v3 = vsub.f32 %v2473_v4, %v2474_v50  ;;  %v2483_v6 = vsub.f32 %v2401_v60, %v2482_v5  ;;  %v3094_v60 = vsub.f32 %v3092_v52, %v3093_v57 }
 0x958   :  { %v2476_v20 = vand.u32 4294901760, %v2475_v3  ;;  %v2484_v19 = vand.u32 4294901760, %v2483_v6 }
 0x95a   :  { %4086 = vmatprep.mubr.f32.mxu0 %v2476_v20  ;;  %v2485_v21 = vsub.f32 %v2483_v6, %v2484_v19 }
 0x95c   :  { %v2486_v51 = vand.u32 4294901760, %v2485_v21 }
 0x95e   :  { %4087 = vmatmul.mubr.f32.vlgmr.msra.gmra.mrb[4].mxu0 %v2486_v51 }
 0x95f   :  { %4461 = vmatpush3.bf16.msra.mxu0 %v4458_v58  ;;  %4097 = vmatprep.mubr.f32.mxu0 %v2472_v1  ;;  %v2981_v58 = vand.u32 4294901760, %v2947_v22 }
 0x960   :  { %4463 = vmatprep.subr.bf16.mxu0 %v4462_v28 }
 0x961   :  { %v5068_v0 = vpack.c.bf16 %v2984_v25, %v2981_v58  ;;  %v3099_v63 = vsub.f32 %v2947_v22, %v2981_v58 }
 0x963   :  { %4465 = vmatpush3.bf16.msra.mxu0 %v4462_v28  ;;  %v3058_v28 = vand.u32 4294901760, %v3057_v26 }
 0x964   :  { %4467 = vmatprep.subr.bf16.mxu0 %v4466_v32 }
 0x966   :  { %4098 = vmatmul.mubr.f32.vlgmr.msra.gmra.mrb[4].mxu0 %v2482_v5 }
 0x967   :  { %4469 = vmatpush3.bf16.msra.mxu0 %v4466_v32  ;;  %4108 = vmatprep.mubr.f32.mxu0 %v2473_v4  ;;  %v3065_v32 = vand.u32 4294901760, %v3064_v27  ;;  %v3087_v4 = vsub.f32 %v3085_v48, %v3086_v55  ;;  %v3560_v55 = vpop.permute.xlu1 %3559 }
 0x968   :  { %4471 = vmatprep.subr.bf16.mxu0 %v4470_v30 }
 0x969   :  { %v3088_v3 = vand.u32 4294901760, %v3087_v4 }
 0x96b   :  { %4473 = vmatpush3.bf16.msra.mxu0 %v4470_v30  ;;  %v5074_v30 = vpack.c.bf16 %v3065_v32, %v3058_v28 }
 0x96c   :  { %4475 = vmatprep.subr.bf16.mxu0 %v5002_v8 }
 0x96e   :  { %4109 = vmatmul.mubr.f32.vlgmr.msra.gmra.mrb[4].mxu0 %v2483_v6  ;;  %v3095_v6 = vand.u32 4294901760, %v3094_v60 }
 0x96f   :  { %4477 = vmatpush3.bf16.msra.mxu0 %v5002_v8  ;;  %4119 = vmatprep.mubr.f32.mxu0 %v2474_v50  ;;  %v3100_v50 = vand.u32 4294901760, %v3099_v63 }
 0x970   :  { %4479 = vmatprep.subr.bf16.mxu0 %v5004_v59  ;;  %v4522_v51 = vpack.c.bf16 %v3095_v6, %v3088_v3 }
 0x973   :  { %4481 = vmatpush3.bf16.msra.mxu0 %v5004_v59 }
 0x974   :  { %4483 = vmatprep.subr.bf16.mxu0 %v4482_v31 }
 0x976   :  { %4120 = vmatmul.mubr.f32.vlgmr.msra.gmra.mrb[4].mxu0 %v2484_v19  ;;  %v3101_v19 = vsub.f32 %v3099_v63, %v3100_v50 }
 0x977   :  { %4485 = vmatpush3.bf16.msra.mxu0 %v4482_v31  ;;  %4130 = vmatprep.mubr.f32.mxu0 %v2472_v1  ;;  %v3059_v31 = vsub.f32 %v3057_v26, %v3058_v28 }
 0x978   :  { %4487 = vmatprep.subr.bf16.mxu0 %v4486_v34  ;;  %v3102_v61 = vand.u32 4294901760, %v3101_v19 }
 0x979   :  { %v3060_v38 = vand.u32 4294901760, %v3059_v31 }
 0x97b   :  { %4489 = vmatpush3.bf16.msra.mxu0 %v4486_v34  ;;  %v3066_v34 = vsub.f32 %v3064_v27, %v3065_v32 }
 0x97c   :  { %4491 = vmatprep.subr.bf16.mxu0 %v5002_v8 }
 0x97d   :  { %v3067_v40 = vand.u32 4294901760, %v3066_v34 }
 0x97e   :  { %4131 = vmatmul.mubr.f32.vlgmr.msra.gmra.mrb[4].mxu0 %v2482_v5 }
 0x97f   :  { %4493 = vmatpush3.bf16.msra.mxu0 %v5002_v8  ;;  %4141 = vmatprep.mubr.f32.mxu0 %v2472_v1  ;;  %v2943_v8 = vld [vmem:[%s5133_s7 + $0x10] sm:$0xff]  ;;  %v5077_v43 = vpack.c.bf16 %v3067_v40, %v3060_v38  ;;  %v3106_v1 = vsub.f32 %v2948_v23, %v2984_v25 }
 0x980   :  { %4495 = vmatprep.subr.bf16.mxu0 %v5004_v59  ;;  %v2969_v29 = vand.u32 4294901760, %v2943_v8 }
 0x982   :  { %v3071_v36 = vsub.f32 %v2943_v8, %v2969_v29 }
 0x983   :  { %4497 = vmatpush3.bf16.msra.mxu0 %v5004_v59  ;;  %v2944_v59 = vld [vmem:[%s5133_s7 + $0x18] sm:$0xff] }
 0x984   :  { %4547 = vmatprep.subr.bf16.mxu0 %v5032_v10  ;;  %v2972_v39 = vand.u32 4294901760, %v2944_v59  ;;  %v3072_v41 = vand.u32 4294901760, %v3071_v36 }
 0x986   :  { %4142 = vmatmul.mubr.f32.vlgmr.msra.gmra.mrb[4].mxu0 %v2482_v5  ;;  %v5044_v14 = vpack.c.bf16 %v2972_v39, %v2969_v29  ;;  %v3078_v37 = vsub.f32 %v2944_v59, %v2972_v39  ;;  %v3073_v45 = vsub.f32 %v3071_v36, %v3072_v41  ;;  %v3107_v5 = vand.u32 4294901760, %v3106_v1 }
 0x987   :  { %4549 = vmatpush3.bf16.msra.mxu0 %v5032_v10  ;;  %v5084_v59 = vpack.c.bf16 %v3092_v52, %v3085_v48  ;;  %v5086_v29 = vpack.c.bf16 %v3106_v1, %v3099_v63  ;;  %v2396_v39 = vrot.slane %v4931_v33, %v1150_v46 }
 0x988   :  { %4551 = vmatprep.subr.bf16.mxu0 %v5044_v14  ;;  %4503 = vmatprep.subr.bf16.mxu1 %v5044_v14  ;;  %v3079_v42 = vand.u32 4294901760, %v3078_v37  ;;  %v3074_v53 = vand.u32 4294901760, %v3073_v45  ;;  %v4574_v20 = vpack.c.bf16 %v3107_v5, %v3100_v50  ;;  %v3108_v21 = vsub.f32 %v3106_v1, %v3107_v5 }
 0x989   :  { %4505 = vmatpush3.bf16.msra.mxu1 %v5044_v14  ;;  %v5082_v8 = vpack.c.bf16 %v3078_v37, %v3071_v36 }
 0x98a   :  { %4507 = vmatprep.subr.bf16.mxu1 %v5056_v13  ;;  %v5079_v44 = vpack.c.bf16 %v3079_v42, %v3072_v41  ;;  %v3080_v47 = vsub.f32 %v3078_v37, %v3079_v42  ;;  %v3109_v7 = vand.u32 4294901760, %v3108_v21 }
 0x98b   :  { %4553 = vmatpush3.bf16.msra.mxu0 %v5044_v14 }
 0x98c   :  { %4555 = vmatprep.subr.bf16.mxu0 %v5056_v13  ;;  %v3081_v54 = vand.u32 4294901760, %v3080_v47  ;;  %v4526_v49 = vpack.c.bf16 %v3109_v7, %v3102_v61 }
 0x98d   :  { %4509 = vmatpush3.bf16.msra.mxu1 %v5056_v13 }
 0x98e   :  { %4511 = vmatprep.subr.bf16.mxu1 %v5068_v0  ;;  %v4518_v62 = vpack.c.bf16 %v3081_v54, %v3074_v53 }
 0x98f   :  { %4557 = vmatpush3.bf16.msra.mxu0 %v5056_v13 }
 0x990   :  { %4559 = vmatprep.subr.bf16.mxu0 %v5068_v0 }
 0x991   :  { %4513 = vmatpush3.bf16.msra.mxu1 %v5068_v0 }
 0x992   :  { %4515 = vmatprep.subr.bf16.mxu1 %v5077_v43 }
 0x993   :  { %4561 = vmatpush3.bf16.msra.mxu0 %v5068_v0 }
 0x994   :  { %4563 = vmatprep.subr.bf16.mxu0 %v5074_v30 }
 0xa59   :  { %v4143_v15 = vpop.f32.mrb[4].mxu0 }
 0xa5a   :  { %v4600_v16 = vadd.f32 %v4143_v15, %v2396_v39  ;;  %v2921_v18 = vpop.f32.mrb[5].mxu0 }
 0xa5b   :  { %v4601_v11 = vadd.f32 %v2921_v18, %v2396_v39 }
 0xa5c   :  { %v2934_v22 = vmul.f32 0.70710677, %v4600_v16  ;;  %v2932_v26 = vmul.f32 0.5, %v4600_v16 }
 0xa5d   :  { %v2933_v23 = vmul.f32 0.70710677, %v4601_v11  ;;  %v2931_v28 = vmul.f32 0.5, %v4601_v11 }
 0xa5e   :  { %4694 = verf.f32 %v2934_v22 }
 0xa5f   :  { %4696 = verf.f32 %v2933_v23 }
 0xa68   :  { %v4695_v58 = vpop.eup %4694 }
 0xa69   :  { %v4697_v25 = vpop.eup %4696  ;;  %v2938_v27 = vadd.f32 1.0, %v4695_v58 }
 0xa6a   :  { %v2937_v32 = vadd.f32 1.0, %v4697_v25 }
 0xa6b   :  { %v2940_v31 = vmul.f32 %v2938_v27, %v2932_v26 }
 0xa6c   :  { %v2939_v34 = vmul.f32 %v2937_v32, %v2931_v28 }
 0xa6d   :  { %v2960_v17 = vsel %vm1724_vm2, %v2940_v31, 0 }
 0xa6e   :  { %v3045_v36 = vand.u32 4294901760, %v2960_v17  ;;  %v2957_v46 = vsel %vm1724_vm2, %v2939_v34, 0 }
 0xa6f   :  { %v3035_v33 = vand.u32 4294901760, %v2957_v46 }
 0xa70   :  { %v3046_v37 = vsub.f32 %v2960_v17, %v3045_v36 }
 0xa71   :  { %v3036_v38 = vsub.f32 %v2957_v46, %v3035_v33 }
 0xa72   :  { %v3047_v40 = vand.u32 4294901760, %v3046_v37 }
 0xa73   :  { %v3037_v41 = vand.u32 4294901760, %v3036_v38 }
 0xa74   :  { %v3048_v42 = vsub.f32 %v3046_v37, %v3047_v40 }
 0xa75   :  { %4217 = vmatprep.mubr.f32.mxu0 %v3037_v41  ;;  %v3038_v45 = vsub.f32 %v3036_v38, %v3037_v41 }
 0xa76   :  { %4218 = vmatmul.mubr.f32.vlgmr.msra.gmra.mrb[6].mxu0 %v3047_v40  ;;  %v3049_v48 = vand.u32 4294901760, %v3048_v42 }
 0xa77   :  { %4565 = vmatpush3.bf16.msra.mxu0 %v5074_v30  ;;  %4236 = vmatprep.mubr.f32.mxu0 %v3035_v33  ;;  %v3039_v47 = vand.u32 4294901760, %v3038_v45 }
 0xa78   :  { %4567 = vmatprep.subr.bf16.mxu0 %v5079_v44 }
 0xa79   :  { %4160 = vmatprep.mubr.f32.mxu1 %v3039_v47 }
 0xa7a   :  { %4161 = vmatmul.mubr.f32.vlgmr.msra.gmra.mrb[4].mxu1 %v3049_v48 }
 0xa7b   :  { %4517 = vmatpush3.bf16.msra.mxu1 %v5077_v43  ;;  %4569 = vmatpush3.bf16.msra.mxu0 %v5079_v44 }
 0xa7c   :  { %4179 = vmatprep.mubr.f32.mxu1 %v3035_v33  ;;  %4519 = vmatprep.subr.bf16.mxu1 %v4518_v62 }
 0xa7d   :  { %4571 = vmatprep.subr.bf16.mxu0 %v4570_v2 }
 0xa7f   :  { %4521 = vmatpush3.bf16.msra.mxu1 %v4518_v62  ;;  %4573 = vmatpush3.bf16.msra.mxu0 %v4570_v2  ;;  %v3555_v62 = vpop.permute.xlu0 %3554 }
 0xa80   :  { %4523 = vmatprep.subr.bf16.mxu1 %v4522_v51  ;;  %4575 = vmatprep.subr.bf16.mxu0 %v4574_v20 }
 0xa83   :  { %4525 = vmatpush3.bf16.msra.mxu1 %v4522_v51  ;;  %4577 = vmatpush3.bf16.msra.mxu0 %v4574_v20 }
 0xa84   :  { %4527 = vmatprep.subr.bf16.mxu1 %v4526_v49  ;;  %4579 = vmatprep.subr.bf16.mxu0 %v5032_v10 }
 0xa86   :  { %4237 = vmatmul.mubr.f32.vlgmr.msra.gmra.mrb[6].mxu0 %v3045_v36 }
 0xa87   :  { %4529 = vmatpush3.bf16.msra.mxu1 %v4526_v49  ;;  %4581 = vmatpush3.bf16.msra.mxu0 %v5032_v10 }
 0xa88   :  { %4255 = vmatprep.mubr.f32.mxu0 %v3035_v33  ;;  %4531 = vmatprep.subr.bf16.mxu1 %v4530_v24 }
 0xa89   :  { %4583 = vmatprep.subr.bf16.mxu0 %v5044_v14 }
 0xa8a   :  { %4180 = vmatmul.mubr.f32.vlgmr.msra.gmra.mrb[4].mxu1 %v3045_v36 }
 0xa8b   :  { %4533 = vmatpush3.bf16.msra.mxu1 %v4530_v24  ;;  %4198 = vmatprep.mubr.f32.mxu1 %v3036_v38 }
 0xa8c   :  { %4585 = vmatpush3.bf16.msra.mxu0 %v5044_v14  ;;  %4535 = vmatprep.subr.bf16.mxu1 %v5082_v8 }
 0xa8d   :  { %4587 = vmatprep.subr.bf16.mxu0 %v5056_v13 }
 0xa8f   :  { %4537 = vmatpush3.bf16.msra.mxu1 %v5082_v8 }
 0xa90   :  { %4589 = vmatpush3.bf16.msra.mxu0 %v5056_v13  ;;  %4539 = vmatprep.subr.bf16.mxu1 %v5084_v59  ;;  %v3573_v13 = vld [vmem:[%s5134_s10] ss:$0 sm:$0xff] }
 0xa91   :  { %4591 = vmatprep.subr.bf16.mxu0 %v5068_v0 }
 0xa93   :  { %4541 = vmatpush3.bf16.msra.mxu1 %v5084_v59 }
 0xa94   :  { %4593 = vmatpush3.bf16.msra.mxu0 %v5068_v0  ;;  %4543 = vmatprep.subr.bf16.mxu1 %v5086_v29 }
 0xa97   :  { %4256 = vmatmul.mubr.f32.vlgmr.msra.gmra.mrb[6].mxu0 %v3045_v36  ;;  %4545 = vmatpush3.bf16.msra.mxu1 %v5086_v29 }
 0xa9a   :  { %4199 = vmatmul.mubr.f32.vlgmr.msra.gmra.mrb[4].mxu1 %v3046_v37 }
 0xb6a   :  { %v4257_v10 = vpop.f32.mrb[6].mxu0 }
 0xb6b   :  { %v3532_v14 = vpop.f32.mrb[7].mxu0 }
 0xb6d   :  { %v4200_v30 = vpop.f32.mrb[4].mxu1 }
 0xb6e   :  { %v4602_v43 = vadd.f32 %v4200_v30, %v3573_v13  ;;  %v3256_v44 = vpop.f32.mrb[5].mxu1 }
 0xb6f   :  { %v4604_v52 = vadd.f32 %v3573_v13, %v3256_v44 }
 0xb70   :  { %v4603_v53 = vadd.f32 %v4602_v43, %v4257_v10 }
 0xb71   :  { %v4605_v54 = vadd.f32 %v4604_v52, %v3532_v14 }
 0xb72   :  { %v3551_v0 = vsub.f32 %v4603_v53, %v4804_v56 }
 0xb73   :  { %v3550_v57 = vsub.f32 %v4605_v54, %v4796_v35 }
 0xb74   :  { %v3563_v63 = vmul.f32 %v3560_v55, %v3551_v0 }
 0xb75   :  { %v3562_v1 = vmul.f32 %v3555_v62, %v3550_v57 }
 0xb76   :  { %v3565_v2 = vadd.f32 %v3563_v63, %v4780_v12 }
 0xb77   :  { %v3564_v4 = vadd.f32 %v3562_v1, %v4777_v9 }
 0xb78   :  { %3568 = vst.msk [vmem:[%s5135_s11 + $0x8] sm:$0xff] %vm3566_vm3, %v3565_v2 }
 0xb79   :  { %3567 = vst.msk [vmem:[%s5135_s11] sm:$0xff] %vm3566_vm3, %v3564_v4 }

</bundles_post_ra>
